<compile_context>
chip_gen: v5e
topology: v5e:2x2
jax: 0.10.0
libtpu: 0.0.40
codegen_flags: <defaults>
</compile_context>

<pallas_src>
import functools

import jax
import jax.numpy as jnp
import numpy as np
from jax import lax
from jax.experimental import pallas as pl
from jax.experimental.pallas import tpu as pltpu

HIGHEST = jax.lax.Precision.HIGHEST

# ---------------- problem sizes (small, consistent with the module) ----------------
BATCH = 2            # number of "instructions" / graphs
MAX_LOCAL = 8        # max_local_entity
N_NODES = BATCH * MAX_LOCAL
N_EDGES = 32
F_IN = 24            # num_in_features (!= num_out_features so skip_proj is exercised)
NUM_HEADS = 2        # num_of_heads
NUM_OUT = 16         # num_out_features
HD = NUM_HEADS * NUM_OUT
EDGE_DIM = 8
HIDDEN_DIM = 32
LN_DIM = 2 * HD      # direction == 'all', concat == True


def _vmem():
    return pl.BlockSpec(memory_space=pltpu.MemorySpace.VMEM)


def _mm(a, b):
    # Mosaic dot lowering supports DEFAULT/HIGHEST only; HIGHEST keeps the 0/1
    # gather/scatter matmuls (near-)exact so the ~1e-3 check stays comfortable.
    return jnp.dot(a, b, precision=HIGHEST, preferred_element_type=jnp.float32)


# ------------------------------- fused Pallas kernel ---------------------------------
def _gat_fused_kernel(
        x_ref, edges_ref, instr_ref, emeta_ref,
        w_ns_ref, w_e_ref, w_i_ref, slab_ref,
        o_ref,
        *, n_nodes, n_edges, batch, heads, dim_out, max_local):
    f32 = jnp.float32
    hd = heads * dim_out
    n, e = n_nodes, n_edges

    # ---- small packed parameters (single DMA) ----
    slab = slab_ref[...]                                   # [8, 3*HD]
    b_instr = slab[0:1, :]                                 # [1, 3*HD] (src|tgt|edge biases)
    scoring = slab[1:2, :]                                 # [1, 3*HD] (scoring_s|scoring_t|scoring_e)
    bias2 = slab[2:3, 0:2 * hd]                            # [1, 2*HD] (concat bias, duplicated)
    ln_g = slab[3:4, 0:2 * hd]
    ln_b = slab[4:5, 0:2 * hd]

    # ---- batched projections (independent MXU ops) ----
    ns = _mm(x_ref[...], w_ns_ref[...])                    # [N, 2*HD] = (proj | skip)
    proj = ns[:, :hd]
    skip = ns[:, hd:]
    eproj = _mm(edges_ref[...], w_e_ref[...])              # [E, HD]
    instr_all = _mm(instr_ref[...], w_i_ref[...]) + b_instr        # [B, 3*HD] (src|tgt|edge)

    # ---- edge metadata: one packed int32 input, both orientations ----
    em = emeta_ref[...]                                    # [E+16, E] int32
    src_col = em[0:e, 0:1]                                 # [E, 1]
    trg_col = em[0:e, 1:2]
    bat_col = em[0:e, 2:3]
    src_row = em[e:e + 1, :]                               # [1, E]   (8-aligned sublane row)
    trg_row = em[e + 8:e + 9, :]                           # [1, E]

    # ---- instruction bridges: per-graph masked selects (no K=2 matmuls) ----
    row_n = lax.broadcasted_iota(jnp.int32, (n, 1), 0)
    node_bridge = jnp.zeros((n, 2 * hd), f32)              # [src_bridge | tgt_bridge] per node
    edge_bridge = jnp.zeros((e, hd), f32)
    for g in range(batch):
        nmask = jnp.logical_and(row_n >= g * max_local,
                                row_n < (g + 1) * max_local).astype(f32)   # [N, 1]
        node_bridge = node_bridge + nmask * instr_all[g:g + 1, :2 * hd]
        emask = (bat_col == g).astype(f32)                                  # [E, 1]
        edge_bridge = edge_bridge + emask * instr_all[g:g + 1, 2 * hd:]

    # ---- per-head segment-sum matrix (blockdiag of ones; head sums on the MXU) ----
    r2 = lax.broadcasted_iota(jnp.int32, (2 * hd, 1), 0)
    c2 = lax.broadcasted_iota(jnp.int32, (1, 2 * hd), 1)
    hs2 = jnp.zeros((2 * hd, 2 * hd), f32)
    for h in range(2 * heads):
        rm = jnp.logical_and(r2 >= h * dim_out, r2 < (h + 1) * dim_out).astype(f32)
        cm = jnp.logical_and(c2 >= h * dim_out, c2 < (h + 1) * dim_out).astype(f32)
        hs2 = hs2 + rm * cm                                 # [2*HD, 2*HD]
    hs1 = hs2[:hd, :hd]                                     # [HD, HD]

    # ---- per-node / per-edge scores, head-broadcast across each head's D lanes ----
    prod_nodes = jnp.concatenate([proj, proj], axis=1) * node_bridge * scoring[:, :2 * hd]
    sc_nodes = _mm(prod_nodes, hs2)                         # [N, 2*HD] = (sc_src | sc_trg)
    sc_edge = _mm(eproj * edge_bridge * scoring[:, 2 * hd:], hs1)   # [E, HD]

    # ---- single gather matmul: lift (proj | node scores) by src and by trg ----
    key_col = jnp.concatenate([src_col, trg_col], axis=0)   # [2E, 1]
    col_n = lax.broadcasted_iota(jnp.int32, (2 * e, n), 1)
    gath = (col_n == key_col).astype(f32)                   # [2E, N]
    node_cat = jnp.concatenate([proj, sc_nodes], axis=1)    # [N, 3*HD]
    lifted = _mm(gath, node_cat)                            # [2E, 3*HD]
    lp_src = lifted[0:e, 0:hd]                              # proj[src]
    sc_s_lift = lifted[0:e, hd:2 * hd]                      # sc_src[src]
    lp_trg = lifted[e:2 * e, 0:hd]                          # proj[trg]
    sc_t_lift = lifted[e:2 * e, 2 * hd:3 * hd]              # sc_trg[trg]

    # ---- scores, LeakyReLU(0.2), globally max-shifted exp (as in the module) ----
    s = sc_s_lift + sc_t_lift + sc_edge                     # [E, HD] head-broadcast
    s = jnp.where(s >= 0, s, 0.2 * s)
    m = jnp.max(jnp.max(s, axis=1, keepdims=True), axis=0, keepdims=True)
    p = jnp.exp(s - m)                                      # [E, HD]

    # ---- fused neighborhood-softmax denominators for BOTH directions (one matmul) ----
    m_trg = (trg_col == trg_row).astype(f32)                # [E, E] same-target indicator
    m_src = (src_col == src_row).astype(f32)                # [E, E] same-source indicator
    denom = _mm(jnp.concatenate([m_trg, m_src], axis=0), p)           # [2E, HD]
    att_trg = p / (denom[0:e] + 1e-16)                      # softmax keyed by trg (exact divide)
    att_src = p / (denom[e:2 * e] + 1e-16)                  # softmax keyed by src

    # ---- fused weighted aggregation, directly lane-concatenated (src_feat | trg_feat) ----
    zeros_e = jnp.zeros((e, hd), f32)
    wmat = jnp.concatenate(
        [jnp.concatenate([lp_trg * att_src, zeros_e], axis=1),
         jnp.concatenate([zeros_e, lp_src * att_trg], axis=1)], axis=0)   # [2E, 2*HD]
    row_iota = lax.broadcasted_iota(jnp.int32, (n, 2 * e), 0)
    scat = (row_iota == jnp.concatenate([src_row, trg_row], axis=1)).astype(f32)  # [N, 2E]
    out = _mm(scat, wmat)                                   # [N, 2*HD]

    # ---- skip + bias + LayerNorm ----
    out = out + jnp.concatenate([skip, skip], axis=1) + bias2
    mean = jnp.mean(out, axis=1, keepdims=True)
    var = jnp.mean((out - mean) ** 2, axis=1, keepdims=True)
    o_ref[...] = (out - mean) * lax.rsqrt(var + 1e-5) * ln_g + ln_b
    # TODO(synk): at production E/N sizes switch the dense one-hot matrices to a
    # scalar-prefetched, edge-tiled grid (PrefetchScalarGridSpec) to keep VMEM O(tile);
    # a v7x two-TensorCore split (grid over graphs, dimension_semantics=("parallel",))
    # only pays off once more than one instruction batch is processed per call.


# ------------------------------- parameter init --------------------------------------
def _xavier(key, shape, fan_in, fan_out):
    bound = float(np.sqrt(6.0 / (fan_in + fan_out)))
    return jax.random.uniform(key, shape, jnp.float32, -bound, bound)


def init_params(key):
    ks = jax.random.split(key, 12)
    p = {}
    # nn.Linear weights are [out, in]; store transposed [in, out] for x @ W^T.
    p['w_proj_t'] = _xavier(ks[0], (F_IN, HD), F_IN, HD)
    p['w_edge_t'] = _xavier(ks[1], (EDGE_DIM, HD), EDGE_DIM, HD)
    p['w_skip_t'] = _xavier(ks[2], (F_IN, HD), F_IN, HD)
    p['w_src_i_t'] = _xavier(ks[3], (HIDDEN_DIM, HD), HIDDEN_DIM, HD)
    p['w_tgt_i_t'] = _xavier(ks[4], (HIDDEN_DIM, HD), HIDDEN_DIM, HD)
    p['w_edge_i_t'] = _xavier(ks[5], (HIDDEN_DIM, HD), HIDDEN_DIM, HD)
    bb = 1.0 / np.sqrt(HIDDEN_DIM)
    p['b_src_i'] = jax.random.uniform(ks[6], (1, HD), jnp.float32, -bb, bb)
    p['b_tgt_i'] = jax.random.uniform(ks[7], (1, HD), jnp.float32, -bb, bb)
    p['b_edge_i'] = jax.random.uniform(ks[8], (1, HD), jnp.float32, -bb, bb)
    # scoring_fn_* : torch shape [1, H, D] -> flattened head-major [1, H*D]
    p['scoring_s'] = _xavier(ks[9], (1, HD), HD, NUM_OUT)
    p['scoring_t'] = _xavier(ks[10], (1, HD), HD, NUM_OUT)
    p['scoring_e'] = _xavier(ks[11], (1, HD), HD, NUM_OUT)
    p['bias'] = jnp.zeros((1, HD), jnp.float32)                 # zero-init (concat bias)
    p['ln_gamma'] = jnp.ones((1, LN_DIM), jnp.float32)
    p['ln_beta'] = jnp.zeros((1, LN_DIM), jnp.float32)
    return p


def pack_params(p):
    """Batch small weights into lane-dense blocks / one param slab (done once)."""
    q = {}
    q['w_ns_t'] = jnp.concatenate([p['w_proj_t'], p['w_skip_t']], axis=1)       # [F_IN, 2*HD]
    q['w_edge_t'] = p['w_edge_t']                                               # [EDGE_DIM, HD]
    q['w_instr_t'] = jnp.concatenate(
        [p['w_src_i_t'], p['w_tgt_i_t'], p['w_edge_i_t']], axis=1)              # [HID, 3*HD]
    slab = jnp.zeros((8, 3 * HD), jnp.float32)
    slab = slab.at[0, :].set(
        jnp.concatenate([p['b_src_i'][0], p['b_tgt_i'][0], p['b_edge_i'][0]]))
    slab = slab.at[1, :].set(
        jnp.concatenate([p['scoring_s'][0], p['scoring_t'][0], p['scoring_e'][0]]))
    slab = slab.at[2, :LN_DIM].set(jnp.concatenate([p['bias'][0], p['bias'][0]]))
    slab = slab.at[3, :LN_DIM].set(p['ln_gamma'][0])
    slab = slab.at[4, :LN_DIM].set(p['ln_beta'][0])
    q['slab'] = slab
    return q


def pack_edge_meta(edge_index, batch_ids):
    """One int32 array carrying (src,trg,batch) columns and src/trg rows (8-aligned)."""
    e = edge_index.shape[1]
    em = jnp.zeros((e + 16, e), jnp.int32)
    em = em.at[:e, 0].set(edge_index[0])
    em = em.at[:e, 1].set(edge_index[1])
    em = em.at[:e, 2].set(batch_ids)
    em = em.at[e, :].set(edge_index[0])
    em = em.at[e + 8, :].set(edge_index[1])
    return em


# ------------------------------- forward (one pallas_call) ---------------------------
def gat_forward(x, edge_index, edges, instructions, batch_ids, max_local_entity, packed):
    n = x.shape[0]
    e = edges.shape[0]
    b = instructions.shape[0]
    emeta = pack_edge_meta(edge_index, batch_ids)

    kernel = functools.partial(
        _gat_fused_kernel,
        n_nodes=n, n_edges=e, batch=b,
        heads=NUM_HEADS, dim_out=NUM_OUT, max_local=max_local_entity)

    return pl.pallas_call(
        kernel,
        out_shape=jax.ShapeDtypeStruct((n, 2 * HD), jnp.float32),
        in_specs=[_vmem()] * 8,
        out_specs=_vmem(),
    )(x, edges, instructions, emeta,
      packed['w_ns_t'], packed['w_edge_t'], packed['w_instr_t'], packed['slab'])


# ------------------------------- pure-JAX reference ----------------------------------
def reference_forward(x, edge_index, edges, instructions, batch_ids, max_local_entity, p):
    n = x.shape[0]
    src, trg = edge_index[0], edge_index[1]
    dot = functools.partial(jnp.dot, precision=HIGHEST)
    proj = dot(x, p['w_proj_t']).reshape(n, NUM_HEADS, NUM_OUT)
    eproj = dot(edges, p['w_edge_t']).reshape(-1, NUM_HEADS, NUM_OUT)
    skip = dot(x, p['w_skip_t']).reshape(n, NUM_HEADS, NUM_OUT)
    src_i = dot(instructions, p['w_src_i_t']) + p['b_src_i']
    tgt_i = dot(instructions, p['w_tgt_i_t']) + p['b_tgt_i']
    edg_i = dot(instructions, p['w_edge_i_t']) + p['b_edge_i']
    source_bridge = jnp.repeat(src_i, max_local_entity, axis=0).reshape(n, NUM_HEADS, NUM_OUT)
    target_bridge = jnp.repeat(tgt_i, max_local_entity, axis=0).reshape(n, NUM_HEADS, NUM_OUT)
    edge_bridge = edg_i[batch_ids].reshape(-1, NUM_HEADS, NUM_OUT)
    sc_s = (proj * p['scoring_s'].reshape(1, NUM_HEADS, NUM_OUT) * source_bridge).sum(-1)
    sc_t = (proj * p['scoring_t'].reshape(1, NUM_HEADS, NUM_OUT) * target_bridge).sum(-1)
    sc_e = (eproj * p['scoring_e'].reshape(1, NUM_HEADS, NUM_OUT) * edge_bridge).sum(-1)
    s = sc_s[src] + sc_t[trg] + sc_e
    s = jnp.where(s >= 0, s, 0.2 * s)
    s = s - s.max()
    ex = jnp.exp(s)

    def branch(agg_idx, gather_idx):
        denom = jax.ops.segment_sum(ex, agg_idx, n)[agg_idx]
        att = ex / (denom + 1e-16)
        weighted = proj[gather_idx] * att[..., None]
        agg = jax.ops.segment_sum(weighted, agg_idx, n)
        out = agg + skip
        return out.reshape(n, HD) + p['bias']

    trg_feat = branch(trg, src)
    src_feat = branch(src, trg)
    out = jnp.concatenate([src_feat, trg_feat], axis=1)
    mean = out.mean(-1, keepdims=True)
    var = ((out - mean) ** 2).mean(-1, keepdims=True)
    return (out - mean) * jax.lax.rsqrt(var + 1e-5) * p['ln_gamma'] + p['ln_beta']


# ------------------------------------ main --------------------------------------------
if __name__ == "__main__":
    key = jax.random.PRNGKey(0)
    k_in, k_edge, k_instr, k_idx, k_par = jax.random.split(key, 5)

    in_nodes_features = jax.random.normal(k_in, (N_NODES, F_IN), jnp.float32)
    edges = jax.random.normal(k_edge, (N_EDGES, EDGE_DIM), jnp.float32)
    instructions = jax.random.normal(k_instr, (BATCH, HIDDEN_DIM), jnp.float32)
    edge_index = jax.random.randint(k_idx, (2, N_EDGES), 0, N_NODES, dtype=jnp.int32)
    batch_ids = (edge_index[0] // MAX_LOCAL).astype(jnp.int32)

    params = init_params(k_par)
    packed = pack_params(params)

    out = gat_forward(in_nodes_features, edge_index, edges, instructions,
                      batch_ids, MAX_LOCAL, packed)
    out = jax.block_until_ready(out)

    ref = reference_forward(in_nodes_features, edge_index, edges, instructions,
                            batch_ids, MAX_LOCAL, params)
    ref = jax.block_until_ready(ref)

    assert out.shape == (N_NODES, LN_DIM), out.shape
    # Exact softmax divide + HIGHEST-precision dots -> expected error ~1e-5; 2e-3 is margin.
    np.testing.assert_allclose(np.asarray(out), np.asarray(ref), rtol=2e-3, atol=2e-3)

    # TODO(synk): training-mode dropout (p=0.6) not implemented; forward runs in eval mode.
    print("KERNEL_OK")
</pallas_src>

<mosaic_0001>
module attributes {stable_mosaic.version = 11 : i64} {
  func.func @_gat_fused_kernel(%arg0: memref<16x24xf32, #tpu.memory_space<vmem>>, %arg1: memref<32x8xf32, #tpu.memory_space<vmem>>, %arg2: memref<2x32xf32, #tpu.memory_space<vmem>>, %arg3: memref<48x32xi32, #tpu.memory_space<vmem>>, %arg4: memref<24x64xf32, #tpu.memory_space<vmem>>, %arg5: memref<8x32xf32, #tpu.memory_space<vmem>>, %arg6: memref<32x96xf32, #tpu.memory_space<vmem>>, %arg7: memref<8x96xf32, #tpu.memory_space<vmem>>, %arg8: memref<16x64xf32, #tpu.memory_space<vmem>>) attributes {dimension_semantics = [], scalar_prefetch = 0 : i64, scratch_operands = 0 : i64, tpu.core_type = #tpu.core_type<tc>} {
    %c0 = arith.constant 0 : index
    %c0_0 = arith.constant 0 : index
    %0 = vector.load %arg7[%c0, %c0_0] : memref<8x96xf32, #tpu.memory_space<vmem>>, vector<8x96xf32>
    %1 = vector.extract_strided_slice %0 {offsets = [0, 0], sizes = [1, 96], strides = [1, 1]} : vector<8x96xf32> to vector<1x96xf32>
    %2 = vector.extract_strided_slice %0 {offsets = [1, 0], sizes = [1, 96], strides = [1, 1]} : vector<8x96xf32> to vector<1x96xf32>
    %3 = vector.extract_strided_slice %0 {offsets = [2, 0], sizes = [1, 64], strides = [1, 1]} : vector<8x96xf32> to vector<1x64xf32>
    %4 = vector.extract_strided_slice %0 {offsets = [3, 0], sizes = [1, 64], strides = [1, 1]} : vector<8x96xf32> to vector<1x64xf32>
    %5 = vector.extract_strided_slice %0 {offsets = [4, 0], sizes = [1, 64], strides = [1, 1]} : vector<8x96xf32> to vector<1x64xf32>
    %c0_1 = arith.constant 0 : index
    %c0_2 = arith.constant 0 : index
    %6 = vector.load %arg0[%c0_1, %c0_2] : memref<16x24xf32, #tpu.memory_space<vmem>>, vector<16x24xf32>
    %c0_3 = arith.constant 0 : index
    %c0_4 = arith.constant 0 : index
    %7 = vector.load %arg4[%c0_3, %c0_4] : memref<24x64xf32, #tpu.memory_space<vmem>>, vector<24x64xf32>
    %cst = arith.constant dense<0.000000e+00> : vector<16x64xf32>
    %8 = tpu.matmul %6, %7, %cst {dimension_numbers = #tpu.dot_dimension_numbers<[1], [0], [0], [1], [0, 0, 1, 1], [], []>, precision = #tpu.contract_precision<fp32>} : vector<16x24xf32>, vector<24x64xf32>, vector<16x64xf32> -> vector<16x64xf32>
    %9 = vector.extract_strided_slice %8 {offsets = [0, 0], sizes = [16, 32], strides = [1, 1]} : vector<16x64xf32> to vector<16x32xf32>
    %10 = vector.extract_strided_slice %8 {offsets = [0, 32], sizes = [16, 32], strides = [1, 1]} : vector<16x64xf32> to vector<16x32xf32>
    %c0_5 = arith.constant 0 : index
    %c0_6 = arith.constant 0 : index
    %11 = vector.load %arg1[%c0_5, %c0_6] : memref<32x8xf32, #tpu.memory_space<vmem>>, vector<32x8xf32>
    %c0_7 = arith.constant 0 : index
    %c0_8 = arith.constant 0 : index
    %12 = vector.load %arg5[%c0_7, %c0_8] : memref<8x32xf32, #tpu.memory_space<vmem>>, vector<8x32xf32>
    %cst_9 = arith.constant dense<0.000000e+00> : vector<32x32xf32>
    %13 = tpu.matmul %11, %12, %cst_9 {dimension_numbers = #tpu.dot_dimension_numbers<[1], [0], [0], [1], [0, 0, 1, 1], [], []>, precision = #tpu.contract_precision<fp32>} : vector<32x8xf32>, vector<8x32xf32>, vector<32x32xf32> -> vector<32x32xf32>
    %c0_10 = arith.constant 0 : index
    %c0_11 = arith.constant 0 : index
    %14 = vector.load %arg2[%c0_10, %c0_11] : memref<2x32xf32, #tpu.memory_space<vmem>>, vector<2x32xf32>
    %c0_12 = arith.constant 0 : index
    %c0_13 = arith.constant 0 : index
    %15 = vector.load %arg6[%c0_12, %c0_13] : memref<32x96xf32, #tpu.memory_space<vmem>>, vector<32x96xf32>
    %cst_14 = arith.constant dense<0.000000e+00> : vector<2x96xf32>
    %16 = tpu.matmul %14, %15, %cst_14 {dimension_numbers = #tpu.dot_dimension_numbers<[1], [0], [0], [1], [0, 0, 1, 1], [], []>, precision = #tpu.contract_precision<fp32>} : vector<2x32xf32>, vector<32x96xf32>, vector<2x96xf32> -> vector<2x96xf32>
    %17 = vector.broadcast %1 : vector<1x96xf32> to vector<2x96xf32>
    %18 = arith.addf %16, %17 : vector<2x96xf32>
    %c0_15 = arith.constant 0 : index
    %c0_16 = arith.constant 0 : index
    %19 = vector.load %arg3[%c0_15, %c0_16] : memref<48x32xi32, #tpu.memory_space<vmem>>, vector<48x32xi32>
    %20 = vector.extract_strided_slice %19 {offsets = [0, 0], sizes = [32, 1], strides = [1, 1]} : vector<48x32xi32> to vector<32x1xi32>
    %21 = vector.extract_strided_slice %19 {offsets = [0, 1], sizes = [32, 1], strides = [1, 1]} : vector<48x32xi32> to vector<32x1xi32>
    %22 = vector.extract_strided_slice %19 {offsets = [0, 2], sizes = [32, 1], strides = [1, 1]} : vector<48x32xi32> to vector<32x1xi32>
    %23 = vector.extract_strided_slice %19 {offsets = [32, 0], sizes = [1, 32], strides = [1, 1]} : vector<48x32xi32> to vector<1x32xi32>
    %24 = vector.extract_strided_slice %19 {offsets = [40, 0], sizes = [1, 32], strides = [1, 1]} : vector<48x32xi32> to vector<1x32xi32>
    %25 = tpu.iota {dimensions = array<i32: 0>} : vector<16x1xi32>
    %cst_17 = arith.constant 0.000000e+00 : f32
    %26 = vector.broadcast %cst_17 : f32 to vector<16x64xf32>
    %cst_18 = arith.constant 0.000000e+00 : f32
    %27 = vector.broadcast %cst_18 : f32 to vector<32x32xf32>
    %c0_i32 = arith.constant 0 : i32
    %28 = vector.broadcast %c0_i32 : i32 to vector<16x1xi32>
    %29 = arith.cmpi sge, %25, %28 : vector<16x1xi32>
    %c8_i32 = arith.constant 8 : i32
    %30 = vector.broadcast %c8_i32 : i32 to vector<16x1xi32>
    %31 = arith.cmpi slt, %25, %30 : vector<16x1xi32>
    %32 = arith.andi %29, %31 : vector<16x1xi1>
    %33 = arith.extui %32 : vector<16x1xi1> to vector<16x1xi32>
    %34 = arith.sitofp %33 : vector<16x1xi32> to vector<16x1xf32>
    %35 = vector.extract_strided_slice %18 {offsets = [0, 0], sizes = [1, 64], strides = [1, 1]} : vector<2x96xf32> to vector<1x64xf32>
    %36 = vector.broadcast %34 : vector<16x1xf32> to vector<16x64xf32>
    %37 = vector.broadcast %35 : vector<1x64xf32> to vector<16x64xf32>
    %38 = arith.mulf %36, %37 : vector<16x64xf32>
    %39 = arith.addf %26, %38 : vector<16x64xf32>
    %c0_i32_19 = arith.constant 0 : i32
    %40 = vector.broadcast %c0_i32_19 : i32 to vector<32x1xi32>
    %41 = arith.cmpi eq, %22, %40 : vector<32x1xi32>
    %42 = arith.extui %41 : vector<32x1xi1> to vector<32x1xi32>
    %43 = arith.sitofp %42 : vector<32x1xi32> to vector<32x1xf32>
    %44 = vector.extract_strided_slice %18 {offsets = [0, 64], sizes = [1, 32], strides = [1, 1]} : vector<2x96xf32> to vector<1x32xf32>
    %45 = vector.broadcast %43 : vector<32x1xf32> to vector<32x32xf32>
    %46 = vector.broadcast %44 : vector<1x32xf32> to vector<32x32xf32>
    %47 = arith.mulf %45, %46 : vector<32x32xf32>
    %48 = arith.addf %27, %47 : vector<32x32xf32>
    %c8_i32_20 = arith.constant 8 : i32
    %49 = vector.broadcast %c8_i32_20 : i32 to vector<16x1xi32>
    %50 = arith.cmpi sge, %25, %49 : vector<16x1xi32>
    %c16_i32 = arith.constant 16 : i32
    %51 = vector.broadcast %c16_i32 : i32 to vector<16x1xi32>
    %52 = arith.cmpi slt, %25, %51 : vector<16x1xi32>
    %53 = arith.andi %50, %52 : vector<16x1xi1>
    %54 = arith.extui %53 : vector<16x1xi1> to vector<16x1xi32>
    %55 = arith.sitofp %54 : vector<16x1xi32> to vector<16x1xf32>
    %56 = vector.extract_strided_slice %18 {offsets = [1, 0], sizes = [1, 64], strides = [1, 1]} : vector<2x96xf32> to vector<1x64xf32>
    %57 = vector.broadcast %55 : vector<16x1xf32> to vector<16x64xf32>
    %58 = vector.broadcast %56 : vector<1x64xf32> to vector<16x64xf32>
    %59 = arith.mulf %57, %58 : vector<16x64xf32>
    %60 = arith.addf %39, %59 : vector<16x64xf32>
    %c1_i32 = arith.constant 1 : i32
    %61 = vector.broadcast %c1_i32 : i32 to vector<32x1xi32>
    %62 = arith.cmpi eq, %22, %61 : vector<32x1xi32>
    %63 = arith.extui %62 : vector<32x1xi1> to vector<32x1xi32>
    %64 = arith.sitofp %63 : vector<32x1xi32> to vector<32x1xf32>
    %65 = vector.extract_strided_slice %18 {offsets = [1, 64], sizes = [1, 32], strides = [1, 1]} : vector<2x96xf32> to vector<1x32xf32>
    %66 = vector.broadcast %64 : vector<32x1xf32> to vector<32x32xf32>
    %67 = vector.broadcast %65 : vector<1x32xf32> to vector<32x32xf32>
    %68 = arith.mulf %66, %67 : vector<32x32xf32>
    %69 = arith.addf %48, %68 : vector<32x32xf32>
    %70 = tpu.iota {dimensions = array<i32: 0>} : vector<64x1xi32>
    %71 = tpu.iota {dimensions = array<i32: 1>} : vector<1x64xi32>
    %cst_21 = arith.constant 0.000000e+00 : f32
    %72 = vector.broadcast %cst_21 : f32 to vector<64x64xf32>
    %c0_i32_22 = arith.constant 0 : i32
    %73 = vector.broadcast %c0_i32_22 : i32 to vector<64x1xi32>
    %74 = arith.cmpi sge, %70, %73 : vector<64x1xi32>
    %c16_i32_23 = arith.constant 16 : i32
    %75 = vector.broadcast %c16_i32_23 : i32 to vector<64x1xi32>
    %76 = arith.cmpi slt, %70, %75 : vector<64x1xi32>
    %77 = arith.andi %74, %76 : vector<64x1xi1>
    %78 = arith.extui %77 : vector<64x1xi1> to vector<64x1xi32>
    %79 = arith.sitofp %78 : vector<64x1xi32> to vector<64x1xf32>
    %c0_i32_24 = arith.constant 0 : i32
    %80 = vector.broadcast %c0_i32_24 : i32 to vector<1x64xi32>
    %81 = arith.cmpi sge, %71, %80 : vector<1x64xi32>
    %c16_i32_25 = arith.constant 16 : i32
    %82 = vector.broadcast %c16_i32_25 : i32 to vector<1x64xi32>
    %83 = arith.cmpi slt, %71, %82 : vector<1x64xi32>
    %84 = arith.andi %81, %83 : vector<1x64xi1>
    %85 = arith.extui %84 : vector<1x64xi1> to vector<1x64xi32>
    %86 = arith.sitofp %85 : vector<1x64xi32> to vector<1x64xf32>
    %87 = vector.broadcast %79 : vector<64x1xf32> to vector<64x64xf32>
    %88 = vector.broadcast %86 : vector<1x64xf32> to vector<64x64xf32>
    %89 = arith.mulf %87, %88 : vector<64x64xf32>
    %90 = arith.addf %72, %89 : vector<64x64xf32>
    %c16_i32_26 = arith.constant 16 : i32
    %91 = vector.broadcast %c16_i32_26 : i32 to vector<64x1xi32>
    %92 = arith.cmpi sge, %70, %91 : vector<64x1xi32>
    %c32_i32 = arith.constant 32 : i32
    %93 = vector.broadcast %c32_i32 : i32 to vector<64x1xi32>
    %94 = arith.cmpi slt, %70, %93 : vector<64x1xi32>
    %95 = arith.andi %92, %94 : vector<64x1xi1>
    %96 = arith.extui %95 : vector<64x1xi1> to vector<64x1xi32>
    %97 = arith.sitofp %96 : vector<64x1xi32> to vector<64x1xf32>
    %c16_i32_27 = arith.constant 16 : i32
    %98 = vector.broadcast %c16_i32_27 : i32 to vector<1x64xi32>
    %99 = arith.cmpi sge, %71, %98 : vector<1x64xi32>
    %c32_i32_28 = arith.constant 32 : i32
    %100 = vector.broadcast %c32_i32_28 : i32 to vector<1x64xi32>
    %101 = arith.cmpi slt, %71, %100 : vector<1x64xi32>
    %102 = arith.andi %99, %101 : vector<1x64xi1>
    %103 = arith.extui %102 : vector<1x64xi1> to vector<1x64xi32>
    %104 = arith.sitofp %103 : vector<1x64xi32> to vector<1x64xf32>
    %105 = vector.broadcast %97 : vector<64x1xf32> to vector<64x64xf32>
    %106 = vector.broadcast %104 : vector<1x64xf32> to vector<64x64xf32>
    %107 = arith.mulf %105, %106 : vector<64x64xf32>
    %108 = arith.addf %90, %107 : vector<64x64xf32>
    %c32_i32_29 = arith.constant 32 : i32
    %109 = vector.broadcast %c32_i32_29 : i32 to vector<64x1xi32>
    %110 = arith.cmpi sge, %70, %109 : vector<64x1xi32>
    %c48_i32 = arith.constant 48 : i32
    %111 = vector.broadcast %c48_i32 : i32 to vector<64x1xi32>
    %112 = arith.cmpi slt, %70, %111 : vector<64x1xi32>
    %113 = arith.andi %110, %112 : vector<64x1xi1>
    %114 = arith.extui %113 : vector<64x1xi1> to vector<64x1xi32>
    %115 = arith.sitofp %114 : vector<64x1xi32> to vector<64x1xf32>
    %c32_i32_30 = arith.constant 32 : i32
    %116 = vector.broadcast %c32_i32_30 : i32 to vector<1x64xi32>
    %117 = arith.cmpi sge, %71, %116 : vector<1x64xi32>
    %c48_i32_31 = arith.constant 48 : i32
    %118 = vector.broadcast %c48_i32_31 : i32 to vector<1x64xi32>
    %119 = arith.cmpi slt, %71, %118 : vector<1x64xi32>
    %120 = arith.andi %117, %119 : vector<1x64xi1>
    %121 = arith.extui %120 : vector<1x64xi1> to vector<1x64xi32>
    %122 = arith.sitofp %121 : vector<1x64xi32> to vector<1x64xf32>
    %123 = vector.broadcast %115 : vector<64x1xf32> to vector<64x64xf32>
    %124 = vector.broadcast %122 : vector<1x64xf32> to vector<64x64xf32>
    %125 = arith.mulf %123, %124 : vector<64x64xf32>
    %126 = arith.addf %108, %125 : vector<64x64xf32>
    %c48_i32_32 = arith.constant 48 : i32
    %127 = vector.broadcast %c48_i32_32 : i32 to vector<64x1xi32>
    %128 = arith.cmpi sge, %70, %127 : vector<64x1xi32>
    %c64_i32 = arith.constant 64 : i32
    %129 = vector.broadcast %c64_i32 : i32 to vector<64x1xi32>
    %130 = arith.cmpi slt, %70, %129 : vector<64x1xi32>
    %131 = arith.andi %128, %130 : vector<64x1xi1>
    %132 = arith.extui %131 : vector<64x1xi1> to vector<64x1xi32>
    %133 = arith.sitofp %132 : vector<64x1xi32> to vector<64x1xf32>
    %c48_i32_33 = arith.constant 48 : i32
    %134 = vector.broadcast %c48_i32_33 : i32 to vector<1x64xi32>
    %135 = arith.cmpi sge, %71, %134 : vector<1x64xi32>
    %c64_i32_34 = arith.constant 64 : i32
    %136 = vector.broadcast %c64_i32_34 : i32 to vector<1x64xi32>
    %137 = arith.cmpi slt, %71, %136 : vector<1x64xi32>
    %138 = arith.andi %135, %137 : vector<1x64xi1>
    %139 = arith.extui %138 : vector<1x64xi1> to vector<1x64xi32>
    %140 = arith.sitofp %139 : vector<1x64xi32> to vector<1x64xf32>
    %141 = vector.broadcast %133 : vector<64x1xf32> to vector<64x64xf32>
    %142 = vector.broadcast %140 : vector<1x64xf32> to vector<64x64xf32>
    %143 = arith.mulf %141, %142 : vector<64x64xf32>
    %144 = arith.addf %126, %143 : vector<64x64xf32>
    %145 = vector.extract_strided_slice %144 {offsets = [0, 0], sizes = [32, 32], strides = [1, 1]} : vector<64x64xf32> to vector<32x32xf32>
    %146 = tpu.concatenate %9, %9 in 1 : vector<16x32xf32>, vector<16x32xf32> -> vector<16x64xf32>
    %147 = arith.mulf %146, %60 : vector<16x64xf32>
    %148 = vector.extract_strided_slice %2 {offsets = [0, 0], sizes = [1, 64], strides = [1, 1]} : vector<1x96xf32> to vector<1x64xf32>
    %149 = vector.broadcast %148 : vector<1x64xf32> to vector<16x64xf32>
    %150 = arith.mulf %147, %149 : vector<16x64xf32>
    %cst_35 = arith.constant dense<0.000000e+00> : vector<16x64xf32>
    %151 = tpu.matmul %150, %144, %cst_35 {dimension_numbers = #tpu.dot_dimension_numbers<[1], [0], [0], [1], [0, 0, 1, 1], [], []>, precision = #tpu.contract_precision<fp32>} : vector<16x64xf32>, vector<64x64xf32>, vector<16x64xf32> -> vector<16x64xf32>
    %152 = arith.mulf %13, %69 : vector<32x32xf32>
    %153 = vector.extract_strided_slice %2 {offsets = [0, 64], sizes = [1, 32], strides = [1, 1]} : vector<1x96xf32> to vector<1x32xf32>
    %154 = vector.broadcast %153 : vector<1x32xf32> to vector<32x32xf32>
    %155 = arith.mulf %152, %154 : vector<32x32xf32>
    %cst_36 = arith.constant dense<0.000000e+00> : vector<32x32xf32>
    %156 = tpu.matmul %155, %145, %cst_36 {dimension_numbers = #tpu.dot_dimension_numbers<[1], [0], [0], [1], [0, 0, 1, 1], [], []>, precision = #tpu.contract_precision<fp32>} : vector<32x32xf32>, vector<32x32xf32>, vector<32x32xf32> -> vector<32x32xf32>
    %157 = tpu.concatenate %20, %21 in 0 : vector<32x1xi32>, vector<32x1xi32> -> vector<64x1xi32>
    %158 = tpu.iota {dimensions = array<i32: 1>} : vector<64x16xi32>
    %159 = vector.broadcast %157 : vector<64x1xi32> to vector<64x16xi32>
    %160 = arith.cmpi eq, %158, %159 : vector<64x16xi32>
    %161 = arith.extui %160 : vector<64x16xi1> to vector<64x16xi32>
    %162 = arith.sitofp %161 : vector<64x16xi32> to vector<64x16xf32>
    %163 = tpu.concatenate %9, %151 in 1 : vector<16x32xf32>, vector<16x64xf32> -> vector<16x96xf32>
    %cst_37 = arith.constant dense<0.000000e+00> : vector<64x96xf32>
    %164 = tpu.matmul %162, %163, %cst_37 {dimension_numbers = #tpu.dot_dimension_numbers<[1], [0], [0], [1], [0, 0, 1, 1], [], []>, precision = #tpu.contract_precision<fp32>} : vector<64x16xf32>, vector<16x96xf32>, vector<64x96xf32> -> vector<64x96xf32>
    %165 = vector.extract_strided_slice %164 {offsets = [0, 0], sizes = [32, 32], strides = [1, 1]} : vector<64x96xf32> to vector<32x32xf32>
    %166 = vector.extract_strided_slice %164 {offsets = [0, 32], sizes = [32, 32], strides = [1, 1]} : vector<64x96xf32> to vector<32x32xf32>
    %167 = vector.extract_strided_slice %164 {offsets = [32, 0], sizes = [32, 32], strides = [1, 1]} : vector<64x96xf32> to vector<32x32xf32>
    %168 = vector.extract_strided_slice %164 {offsets = [32, 64], sizes = [32, 32], strides = [1, 1]} : vector<64x96xf32> to vector<32x32xf32>
    %169 = arith.addf %166, %168 : vector<32x32xf32>
    %170 = arith.addf %169, %156 : vector<32x32xf32>
    %cst_38 = arith.constant 0.000000e+00 : f32
    %171 = vector.broadcast %cst_38 : f32 to vector<32x32xf32>
    %172 = arith.cmpf oge, %170, %171 : vector<32x32xf32>
    %cst_39 = arith.constant 2.000000e-01 : f32
    %173 = vector.broadcast %cst_39 : f32 to vector<32x32xf32>
    %174 = arith.mulf %173, %170 : vector<32x32xf32>
    %175 = arith.select %172, %170, %174 : vector<32x32xi1>, vector<32x32xf32>
    %cst_40 = arith.constant dense<0xFF800000> : vector<32xf32>
    %176 = vector.multi_reduction <maximumf>, %175, %cst_40 [1] : vector<32x32xf32> to vector<32xf32>
    %177 = vector.shape_cast %176 : vector<32xf32> to vector<32x1xf32>
    %cst_41 = arith.constant dense<0xFF800000> : vector<1xf32>
    %178 = vector.multi_reduction <maximumf>, %177, %cst_41 [0] : vector<32x1xf32> to vector<1xf32>
    %179 = vector.shape_cast %178 : vector<1xf32> to vector<1x1xf32>
    %180 = vector.broadcast %179 : vector<1x1xf32> to vector<32x32xf32>
    %181 = arith.subf %175, %180 : vector<32x32xf32>
    %182 = math.exp %181 : vector<32x32xf32>
    %183 = vector.broadcast %21 : vector<32x1xi32> to vector<32x32xi32>
    %184 = vector.broadcast %24 : vector<1x32xi32> to vector<32x32xi32>
    %185 = arith.cmpi eq, %183, %184 : vector<32x32xi32>
    %186 = arith.extui %185 : vector<32x32xi1> to vector<32x32xi32>
    %187 = arith.sitofp %186 : vector<32x32xi32> to vector<32x32xf32>
    %188 = vector.broadcast %20 : vector<32x1xi32> to vector<32x32xi32>
    %189 = vector.broadcast %23 : vector<1x32xi32> to vector<32x32xi32>
    %190 = arith.cmpi eq, %188, %189 : vector<32x32xi32>
    %191 = arith.extui %190 : vector<32x32xi1> to vector<32x32xi32>
    %192 = arith.sitofp %191 : vector<32x32xi32> to vector<32x32xf32>
    %193 = tpu.concatenate %187, %192 in 0 : vector<32x32xf32>, vector<32x32xf32> -> vector<64x32xf32>
    %cst_42 = arith.constant dense<0.000000e+00> : vector<64x32xf32>
    %194 = tpu.matmul %193, %182, %cst_42 {dimension_numbers = #tpu.dot_dimension_numbers<[1], [0], [0], [1], [0, 0, 1, 1], [], []>, precision = #tpu.contract_precision<fp32>} : vector<64x32xf32>, vector<32x32xf32>, vector<64x32xf32> -> vector<64x32xf32>
    %195 = vector.extract_strided_slice %194 {offsets = [0, 0], sizes = [32, 32], strides = [1, 1]} : vector<64x32xf32> to vector<32x32xf32>
    %cst_43 = arith.constant 1.000000e-16 : f32
    %196 = vector.broadcast %cst_43 : f32 to vector<32x32xf32>
    %197 = arith.addf %195, %196 : vector<32x32xf32>
    %198 = arith.divf %182, %197 : vector<32x32xf32>
    %199 = vector.extract_strided_slice %194 {offsets = [32, 0], sizes = [32, 32], strides = [1, 1]} : vector<64x32xf32> to vector<32x32xf32>
    %cst_44 = arith.constant 1.000000e-16 : f32
    %200 = vector.broadcast %cst_44 : f32 to vector<32x32xf32>
    %201 = arith.addf %199, %200 : vector<32x32xf32>
    %202 = arith.divf %182, %201 : vector<32x32xf32>
    %cst_45 = arith.constant 0.000000e+00 : f32
    %203 = vector.broadcast %cst_45 : f32 to vector<32x32xf32>
    %204 = arith.mulf %167, %202 : vector<32x32xf32>
    %205 = tpu.concatenate %204, %203 in 1 : vector<32x32xf32>, vector<32x32xf32> -> vector<32x64xf32>
    %206 = arith.mulf %165, %198 : vector<32x32xf32>
    %207 = tpu.concatenate %203, %206 in 1 : vector<32x32xf32>, vector<32x32xf32> -> vector<32x64xf32>
    %208 = tpu.concatenate %205, %207 in 0 : vector<32x64xf32>, vector<32x64xf32> -> vector<64x64xf32>
    %209 = tpu.iota {dimensions = array<i32: 0>} : vector<16x64xi32>
    %210 = tpu.concatenate %23, %24 in 1 : vector<1x32xi32>, vector<1x32xi32> -> vector<1x64xi32>
    %211 = vector.broadcast %210 : vector<1x64xi32> to vector<16x64xi32>
    %212 = arith.cmpi eq, %209, %211 : vector<16x64xi32>
    %213 = arith.extui %212 : vector<16x64xi1> to vector<16x64xi32>
    %214 = arith.sitofp %213 : vector<16x64xi32> to vector<16x64xf32>
    %cst_46 = arith.constant dense<0.000000e+00> : vector<16x64xf32>
    %215 = tpu.matmul %214, %208, %cst_46 {dimension_numbers = #tpu.dot_dimension_numbers<[1], [0], [0], [1], [0, 0, 1, 1], [], []>, precision = #tpu.contract_precision<fp32>} : vector<16x64xf32>, vector<64x64xf32>, vector<16x64xf32> -> vector<16x64xf32>
    %216 = tpu.concatenate %10, %10 in 1 : vector<16x32xf32>, vector<16x32xf32> -> vector<16x64xf32>
    %217 = arith.addf %215, %216 : vector<16x64xf32>
    %218 = vector.broadcast %3 : vector<1x64xf32> to vector<16x64xf32>
    %219 = arith.addf %217, %218 : vector<16x64xf32>
    %cst_47 = arith.constant dense<0.000000e+00> : vector<16xf32>
    %220 = vector.multi_reduction <add>, %219, %cst_47 [1] : vector<16x64xf32> to vector<16xf32>
    %221 = vector.shape_cast %220 : vector<16xf32> to vector<16x1xf32>
    %cst_48 = arith.constant 6.400000e+01 : f32
    %222 = vector.broadcast %cst_48 : f32 to vector<16x1xf32>
    %223 = arith.divf %221, %222 : vector<16x1xf32>
    %224 = vector.broadcast %223 : vector<16x1xf32> to vector<16x64xf32>
    %225 = arith.subf %219, %224 : vector<16x64xf32>
    %226 = arith.mulf %225, %225 : vector<16x64xf32>
    %cst_49 = arith.constant dense<0.000000e+00> : vector<16xf32>
    %227 = vector.multi_reduction <add>, %226, %cst_49 [1] : vector<16x64xf32> to vector<16xf32>
    %228 = vector.shape_cast %227 : vector<16xf32> to vector<16x1xf32>
    %cst_50 = arith.constant 6.400000e+01 : f32
    %229 = vector.broadcast %cst_50 : f32 to vector<16x1xf32>
    %230 = arith.divf %228, %229 : vector<16x1xf32>
    %231 = vector.broadcast %223 : vector<16x1xf32> to vector<16x64xf32>
    %232 = arith.subf %219, %231 : vector<16x64xf32>
    %cst_51 = arith.constant 9.99999974E-6 : f32
    %233 = vector.broadcast %cst_51 : f32 to vector<16x1xf32>
    %234 = arith.addf %230, %233 : vector<16x1xf32>
    %235 = math.rsqrt %234 : vector<16x1xf32>
    %236 = vector.broadcast %235 : vector<16x1xf32> to vector<16x64xf32>
    %237 = arith.mulf %232, %236 : vector<16x64xf32>
    %238 = vector.broadcast %4 : vector<1x64xf32> to vector<16x64xf32>
    %239 = arith.mulf %237, %238 : vector<16x64xf32>
    %240 = vector.broadcast %5 : vector<1x64xf32> to vector<16x64xf32>
    %241 = arith.addf %239, %240 : vector<16x64xf32>
    %c0_52 = arith.constant 0 : index
    %c0_53 = arith.constant 0 : index
    %242 = vector.load %arg8[%c0_52, %c0_53] : memref<16x64xf32, #tpu.memory_space<vmem>>, vector<16x64xf32>
    tpu.vector_store %arg8[%c0_52, %c0_53], %241 {strides = array<i32>} : memref<16x64xf32, #tpu.memory_space<vmem>>, vector<16x64xf32>,
    return
  }
}

</mosaic_0001>

<bundles_post_ra>
// kernel: tpu_custom_call.1
= control target key start
LH: loop header
LB: loop body
LE: loop exit
PB: predicated region body
PF: predicated region fallthrough
CT: control target
= control target key end

     0   :  { %vm36_vm0 = vcmask 195584   ;;  %s4441_s0 = inlined_call_operand.vmem [shape: f32[16,24], index: 0, kind: input, shape index: {}]   ;;  %s4442_s1 = inlined_call_operand.vmem [shape: f32[32,8], index: 1, kind: input, shape index: {}]   ;;  %s4443_s2 = inlined_call_operand.vmem [shape: f32[2,32], index: 2, kind: input, shape index: {}]   ;;  %s4444_s3 = inlined_call_operand.vmem [shape: s32[48,32], index: 3, kind: input, shape index: {}]   ;;  %s4445_s4 = inlined_call_operand.vmem [shape: f32[24,64], index: 4, kind: input, shape index: {}]   ;;  %s4446_s5 = inlined_call_operand.vmem [shape: f32[8,32], index: 5, kind: input, shape index: {}]   ;;  %s4447_s6 = inlined_call_operand.vmem [shape: f32[32,96], index: 6, kind: input, shape index: {}]   ;;  %s4448_s7 = inlined_call_operand.vmem [shape: f32[8,96], index: 7, kind: input, shape index: {}]   ;;  %s4449_s8 = inlined_call_operand.hbm [shape: f32[16,64], index: 8, kind: output, shape index: {}]  }
   0x1   :  { %v35_v0 = vld [vmem:[%s4445_s4 + $0x10] sm:$0xff]  ;;  %v34_v1 = vld [vmem:[%s4445_s4 + $0x8] sm:$0xff]  ;;  %v33_v2 = vld [vmem:[%s4445_s4] sm:$0xff] }
   0x2   :  { %v56_v3 = vand.u32 4294901760, %v35_v0  ;;  %v58_v4 = vand.u32 4294901760, %v34_v1  ;;  %v3559_v5 = vand.u32 4294901760, %v33_v2  ;;  %v32_v6 = vld [vmem:[%s4441_s0 + $0x8] sm:$0xff]  ;;  %v31_v7 = vld [vmem:[%s4441_s0] sm:$0xff] }
   0x3   :  { %v41_v8 = vsel %vm36_vm0, %v32_v6, 0  ;;  %v38_v9 = vsel %vm36_vm0, %v31_v7, 0  ;;  %v250_v14 = vld [vmem:[%s4446_s5] sm:$0xff] }
   0x4   :  { %3386 = vmatpush.msra.mxu2 %v56_v3  ;;  %57 = vmatpush.msra.mxu0 %v56_v3  ;;  %v93_v10 = vsub.f32 %v35_v0, %v56_v3  ;;  %v3567_v11 = vand.u32 4294901760, %v41_v8  ;;  %v99_v12 = vsub.f32 %v34_v1, %v58_v4  ;;  %v62_v13 = vand.u32 4294901760, %v38_v9 }
   0x5   :  { %13 = vsyncpa [#allocation3], 0  ;;  %v105_v15 = vsub.f32 %v33_v2, %v3559_v5  ;;  %v3576_v21 = vand.u32 4294901760, %v250_v14  ;;  %v246_v35 = vld [vmem:[%s4442_s1] sm:$0xff]  ;;  %vm251_vm1 = vcmask 64512   ;;  %v247_v38 = vld [vmem:[%s4442_s1 + $0x8] sm:$0xff] }
   0x6   :  { %3387 = vmatpush.msra.mxu2 %v58_v4  ;;  %59 = vmatpush.msra.mxu0 %v58_v4  ;;  %v94_v16 = vand.u32 4294901760, %v93_v10  ;;  %v3574_v17 = vsub.f32 %v41_v8, %v3567_v11  ;;  %v100_v18 = vand.u32 4294901760, %v99_v12  ;;  %v63_v19 = vsub.f32 %v38_v9, %v62_v13  ;;  %v507_v40 = vld [vmem:[%s4447_s6 + $0x18] sm:$0xff]  ;;  %v506_v44 = vld [vmem:[%s4447_s6 + $0x10] sm:$0xff]  ;;  %v505_v50 = vld [vmem:[%s4447_s6 + $0x8] sm:$0xff]  ;;  %s3495_s4 = smov 32  }
   0x7   :  { %v106_v20 = vand.u32 4294901760, %v105_v15  ;;  %v330_v34 = vsub.f32 %v250_v14, %v3576_v21  ;;  %v253_v36 = vsel %vm251_vm1, %v246_v35, 0  ;;  %v256_v41 = vsel %vm251_vm1, %v247_v38, 0  ;;  %v248_v54 = vld [vmem:[%s4442_s1 + $0x10] sm:$0xff]  ;;  %v504_v57 = vld [vmem:[%s4447_s6] sm:$0xff]  ;;  %s3496_s5 = smov 64  }
   0x8   :  { %3388 = vmatpush.msra.mxu2 %v3559_v5  ;;  %v95_v22 = vsub.f32 %v93_v10, %v94_v16  ;;  %v72_v23 = vand.u32 4294901760, %v3574_v17  ;;  %61 = vmatpush.msra.mxu0 %v3559_v5  ;;  %v101_v24 = vsub.f32 %v99_v12, %v100_v18  ;;  %v64_v25 = vand.u32 4294901760, %v63_v19  ;;  %s3497_s16 = smov 127   ;;  %s3499_s17 = smov 96  }
   0x9   :  { %v107_v26 = vsub.f32 %v105_v15, %v106_v20  ;;  %v3591_v37 = vand.u32 4294901760, %v253_v36  ;;  %v331_v42 = vand.u32 4294901760, %v330_v34  ;;  %v3604_v43 = vand.u32 4294901760, %v507_v40  ;;  %s3290_s9 = sshll.u32 %s4449_s8, 4  ;;  %s3503_s10 = smov 128   ;;  %s3291_s9 = int_to_ptr.hbm [resolvable:$true] %s3290_s9 }
   0xa   :  { %134 = vmatpush.msrb.mxu2 %v93_v10  ;;  %200 = vmatpush.msrb.mxu0 %v94_v16  ;;  %v96_v27 = vand.u32 4294901760, %v95_v22  ;;  %v73_v28 = vsub.f32 %v3574_v17, %v72_v23  ;;  %v102_v29 = vand.u32 4294901760, %v101_v24  ;;  %v65_v30 = vsub.f32 %v63_v19, %v64_v25  ;;  %s3504_s11 = smov 8  }
   0xb   :  { %v108_v33 = vand.u32 4294901760, %v107_v26  ;;  %v282_v39 = vsub.f32 %v253_v36, %v3591_v37  ;;  %v332_v45 = vsub.f32 %v330_v34, %v331_v42  ;;  %v3611_v46 = vsub.f32 %v507_v40, %v3604_v43 }
   0xc   :  { %137 = vmatpush.msrb.mxu2 %v99_v12  ;;  %204 = vmatpush.msrb.mxu0 %v100_v18  ;;  %v74_v31 = vand.u32 4294901760, %v73_v28  ;;  %v66_v32 = vand.u32 4294901760, %v65_v30  ;;  %v3613_v48 = vand.u32 4294901760, %v256_v41  ;;  %v3615_v49 = vand.u32 4294901760, %v506_v44  ;;  %v249_v12 = vld [vmem:[%s4442_s1 + $0x18] sm:$0xff]  ;;  %v3701_v30 = vld [vmem:[%s4444_s3 + $0x8] sm:$0xff] }
   0xd   :  { %97 = vmatpush.msra.mxu1 %v96_v27  ;;  %3389 = vmatpush.msra.mxu3 %v96_v27  ;;  %v283_v47 = vand.u32 4294901760, %v282_v39  ;;  %v333_v51 = vand.u32 4294901760, %v332_v45  ;;  %v556_v52 = vand.u32 4294901760, %v3611_v46  ;;  %v3621_v53 = vand.u32 4294901760, %v505_v50  ;;  %v3716_v45 = vld [vmem:[%s4444_s3 + $0x10] sm:$0xff] }
   0xe   :  { %140 = vmatpush.msrb.mxu2 %v105_v15  ;;  %208 = vmatpush.msrb.mxu0 %v106_v20  ;;  %v3629_v56 = vsub.f32 %v506_v44, %v3615_v49  ;;  %v3638_v59 = vand.u32 4294901760, %v504_v57  ;;  %v290_v61 = vsub.f32 %v256_v41, %v3613_v48  ;;  %v259_v63 = vsel %vm251_vm1, %v248_v54, 0  ;;  %v503_v20 = vld [vmem:[%s4443_s2] sm:$0x3] }
   0xf   :  { %75 = vmatmul.f32.vlgmr.msra.gmra.mxu2 %v74_v31  ;;  %103 = vmatpush.msra.mxu1 %v102_v29  ;;  %v284_v55 = vsub.f32 %v282_v39, %v283_v47  ;;  %v557_v58 = vsub.f32 %v3611_v46, %v556_v52  ;;  %v3641_v60 = vsub.f32 %v505_v50, %v3621_v53  ;;  %v3663_v8 = vand.u32 4294901760, %v259_v63 }
  0x10   :  { %3390 = vmatpush.msra.mxu3 %v102_v29  ;;  %67 = vmatmul.f32.vlgmr.msra.gmra.mxu0 %v66_v32  ;;  %v562_v62 = vand.u32 4294901760, %v3629_v56  ;;  %v3651_v2 = vsub.f32 %v504_v57, %v3638_v59  ;;  %v291_v7 = vand.u32 4294901760, %v290_v61  ;;  %v262_v16 = vsel %vm251_vm1, %v249_v12, 0  ;;  %v3696_v29 = vld [vmem:[%s4444_s3] sm:$0xff] }
  0x11   :  { %109 = vmatpush.msra.mxu1 %v108_v33  ;;  %369 = vmatpush.msra.mxu0 %v330_v34  ;;  %v558_v0 = vand.u32 4294901760, %v557_v58  ;;  %v568_v1 = vand.u32 4294901760, %v3641_v60  ;;  %v298_v15 = vsub.f32 %v259_v63, %v3663_v8  ;;  %vm509_vm2 = vcmask 261120  }
  0x12   :  { %3391 = vmatpush.msra.mxu3 %v108_v33  ;;  %111 = vmatmul.f32.vlgmr.msra.gmra.mxu1 %v62_v13  ;;  %v574_v6 = vand.u32 4294901760, %v3651_v2  ;;  %v3493_v32 = vmov 2   ;;  %vm722_vm3 = vcmp.eq.s32.totalorder %v3696_v29, 0  ;;  %vm777_vm4 = vcmp.eq.s32.totalorder %v3696_v29, 1 }
  0x13   :  { %115 = vmatmul.f32.vlgmr.msra.gmra.mxu3 %v3567_v11  ;;  %232 = vmatpush.msrb.mxu1 %v56_v3  ;;  %v299_v18 = vand.u32 4294901760, %v298_v15  ;;  %v3494_v34 = vmov 0.0   ;;  %vm723_vm5 = vcmp.eq.s32.totalorder %v3701_v30, 0  ;;  %vm778_vm6 = vcmp.eq.s32.totalorder %v3701_v30, 1 }
  0x14   :  { %166 = vmatpush.msrb.mxu3 %v56_v3  ;;  %280 = vmatpush.msra.mxu2 %v3576_v21  ;;  %v285_v3 = vand.u32 4294901760, %v284_v55  ;;  %v3302_v35 = vsel %vm722_vm3, 1.0, %v3494_v34  ;;  %v3306_v36 = vsel %vm777_vm4, 1.0, %v3494_v34  ;;  %v3303_v40 = vsel %vm723_vm5, 1.0, %v3494_v34 }
  0x15   :  { %234 = vmatpush.msrb.mxu1 %v58_v4  ;;  %3404 = vset.pattern.permute.xlu1 %v3493_v32  ;;  %v3405_v38 = vpack.i.bf16 %v3306_v36, %v3302_v35  ;;  %v3307_v41 = vsel %vm778_vm6, 1.0, %v3494_v34  ;;  %vm724_vm7 = vcmp.eq.s32.totalorder %v3716_v45, 0  ;;  %vm779_vm8 = vcmp.eq.s32.totalorder %v3716_v45, 1 }
  0x16   :  { %168 = vmatpush.msrb.mxu3 %v58_v4  ;;  %v563_v4 = vsub.f32 %v3629_v56, %v562_v62  ;;  %3415 = vset.pattern.permute.xlu2 %v3493_v32  ;;  %v3304_v50 = vsel %vm724_vm7, 1.0, %v3494_v34  ;;  %vm1080_vm6 = vcmask 523264  }
  0x17   :  { %143 = vmatmul.f32.vlgmr.msrb.gmra.mxu2 %v63_v19  ;;  %236 = vmatpush.msrb.mxu1 %v3559_v5  ;;  %v3677_v19 = vand.u32 4294901760, %v262_v16 }
  0x18   :  { %210 = vmatmul.f32.vlgmr.msrb.gmra.mxu0 %v62_v13  ;;  %170 = vmatpush.msrb.mxu3 %v3559_v5  ;;  %v569_v5 = vsub.f32 %v3641_v60, %v568_v1  ;;  %v564_v9 = vand.u32 4294901760, %v563_v4 }
  0x19   :  { %407 = vmatpush.msra.mxu1 %v3576_v21  ;;  %526 = vmatpush.msrb.mxu0 %v3604_v43  ;;  %v306_v22 = vsub.f32 %v262_v16, %v3677_v19 }
  0x1a   :  { %238 = vmatmul.f32.vlgmr.msrb.gmra.mxu1 %v62_v13  ;;  %451 = vmatpush.msrb.mxu2 %v331_v42  ;;  %v570_v10 = vand.u32 4294901760, %v569_v5  ;;  %v292_v13 = vsub.f32 %v290_v61, %v291_v7  ;;  %v3410_v42 = vpack.i.bf16 %v3307_v41, %v3303_v40 }
  0x1b   :  { %174 = vmatmul.f32.vlgmr.msrb.gmra.mxu3 %v64_v25  ;;  %528 = vmatpush.msrb.mxu0 %v3615_v49  ;;  %v307_v26 = vand.u32 4294901760, %v306_v22 }
  0x1c   :  { %334 = vmatpush.msra.mxu3 %v333_v51  ;;  %559 = vmatpush.msrb.mxu1 %v558_v0  ;;  %v3308_v51 = vsel %vm779_vm8, 1.0, %v3494_v34  ;;  %vm1739_vm8 = vcmask 130048  }
  0x1d   :  { %530 = vmatpush.msrb.mxu0 %v3621_v53  ;;  %v308_v27 = vsub.f32 %v306_v22, %v307_v26  ;;  %3406 = vperm.xlu1 %3404, %v3405_v38   ;;  %v3416_v54 = vpack.i.bf16 %v3308_v51, %v3304_v50 }
  0x1e   :  { %485 = vmatpush.msrb.mxu3 %v3576_v21  ;;  %565 = vmatpush.msrb.mxu1 %v564_v9  ;;  %v300_v21 = vsub.f32 %v298_v15, %v299_v18 }
  0x1f   :  { %148 = vmatmul.f32.gmra.mxu2 %v3574_v17  ;;  %532 = vmatpush.msrb.mxu0 %v3638_v59  ;;  %v293_v17 = vand.u32 4294901760, %v292_v13  ;;  %v309_v31 = vand.u32 4294901760, %v308_v27 }
  0x20   :  { %214 = vmatmul.f32.gmra.mxu0 %v3567_v11  ;;  %571 = vmatpush.msrb.mxu1 %v570_v10  ;;  %v301_v24 = vand.u32 4294901760, %v300_v21 }
  0x21   :  { %3417 = vperm.xlu2 %3415, %v3416_v54  }
  0x22   :  { %242 = vmatmul.f32.gmra.mxu1 %v3567_v11  ;;  %v575_v11 = vsub.f32 %v3651_v2, %v574_v6 }
  0x23   :  { %180 = vmatmul.f32.gmra.mxu3 %v72_v23  ;;  %v511_v23 = vsel %vm509_vm2, %v503_v20, 0 }
  0x24   :  { %v576_v14 = vand.u32 4294901760, %v575_v11  ;;  %v3690_v25 = vand.u32 4294901760, %v511_v23 }
  0x25   :  { %3411 = vperm.xlu1 %3404, %v3410_v42  }
  0x26   :  { %577 = vmatpush.msrb.mxu1 %v576_v14  ;;  %v534_v28 = vsub.f32 %v511_v23, %v3690_v25 }
  0x27   :  { %286 = vmatmul.f32.vlgmr.msra.gmra.mxu2 %v285_v3 }
  0x28   :  { %372 = vmatmul.f32.vlgmr.msra.gmra.mxu0 %v282_v39  ;;  %v535_v33 = vand.u32 4294901760, %v534_v28 }
  0x29   :  { %597 = vmatpush.msra.mxu0 %v3611_v46 }
  0x2a   :  { %411 = vmatmul.f32.vlgmr.msra.gmra.mxu1 %v283_v47  ;;  %v536_v39 = vsub.f32 %v534_v28, %v535_v33  ;;  %v3721_v47 = vld [vmem:[%s4444_s3 + $0x18] sm:$0xff] }
  0x2b   :  { %336 = vmatmul.f32.vlgmr.msra.gmra.mxu3 %v3591_v37  ;;  %600 = vmatpush.msra.mxu0 %v3629_v56  ;;  %vm725_vm9 = vcmp.eq.s32.totalorder %v3721_v47, 0  ;;  %vm780_vm10 = vcmp.eq.s32.totalorder %v3721_v47, 1 }
  0x2c   :  { %626 = vmatpush.msra.mxu1 %v3604_v43  ;;  %v537_v44 = vand.u32 4294901760, %v536_v39  ;;  %v3305_v55 = vsel %vm725_vm9, 1.0, %v3494_v34  ;;  %v3309_v57 = vsel %vm780_vm10, 1.0, %v3494_v34 }
  0x2d   :  { %603 = vmatpush.msra.mxu0 %v3641_v60  ;;  %v3421_v46 = vpack.i.bf16 %v3309_v57, %v3305_v55 }
  0x2e   :  { %628 = vmatpush.msra.mxu1 %v3615_v49 }
  0x2f   :  { %294 = vmatmul.f32.gmra.mxu2 %v293_v17  ;;  %606 = vmatpush.msra.mxu0 %v3651_v2 }
  0x30   :  { %377 = vmatmul.f32.gmra.mxu0 %v290_v61  ;;  %630 = vmatpush.msra.mxu1 %v3621_v53 }
  0x31   :  { %3422 = vperm.xlu2 %3415, %v3421_v46  }
  0x32   :  { %417 = vmatmul.f32.gmra.mxu1 %v291_v7 }
  0x33   :  { %340 = vmatmul.f32.gmra.mxu3 %v3613_v48  ;;  %632 = vmatpush.msra.mxu1 %v3638_v59 }
  0x37   :  { %302 = vmatmul.f32.gmra.mxu2 %v301_v24  ;;  %v3498_v24 = vmov 0  }
  0x38   :  { %382 = vmatmul.f32.gmra.mxu0 %v298_v15  ;;  %3426 = vset.pattern.permute.xlu1 %v3498_v24 }
  0x39   :  { %3427 = vset.pattern.permute.xlu0 %v3498_v24  ;;  %3428 = vset.pattern.permute.xlu2 %v3498_v24 }
  0x3a   :  { %423 = vmatmul.f32.gmra.mxu1 %v299_v18 }
  0x3b   :  { %344 = vmatmul.f32.gmra.mxu3 %v3663_v8 }
  0x3f   :  { %310 = vmatmul.f32.gmra.mxu2 %v309_v31 }
  0x40   :  { %387 = vmatmul.f32.gmra.mxu0 %v306_v22 }
  0x42   :  { %429 = vmatmul.f32.gmra.mxu1 %v307_v26 }
  0x43   :  { %348 = vmatmul.f32.gmra.mxu3 %v3677_v19 }
  0x47   :  { %453 = vmatmul.f32.vlgmr.msrb.gmra.mxu2 %v3591_v37 }
  0x48   :  { %538 = vmatmul.f32.vlgmr.msrb.gmra.mxu0 %v537_v44 }
  0x49   :  { %655 = vmatpush.msrb.mxu0 %v556_v52 }
  0x4a   :  { %579 = vmatmul.f32.vlgmr.msrb.gmra.mxu1 %v3690_v25 }
  0x4b   :  { %659 = vmatpush.msrb.mxu0 %v562_v62  ;;  %686 = vmatpush.msrb.mxu1 %v3604_v43 }
  0x4c   :  { %487 = vmatmul.f32.vlgmr.msrb.gmra.mxu3 %v3591_v37 }
  0x4d   :  { %663 = vmatpush.msrb.mxu0 %v568_v1  ;;  %688 = vmatpush.msrb.mxu1 %v3615_v49 }
  0x4f   :  { %667 = vmatpush.msrb.mxu0 %v574_v6  ;;  %690 = vmatpush.msrb.mxu1 %v3621_v53  ;;  %v30_v6 = vld [vmem:[%s4448_s7] sm:$0xff] }
  0x50   :  { %609 = vmatmul.f32.vlgmr.msra.gmra.mxu0 %v534_v28  ;;  %457 = vmatmul.f32.gmra.mxu2 %v3613_v48  ;;  %v3765_v10 = vperm.slane %v30_v6, 1 }
  0x51   :  { %692 = vmatpush.msrb.mxu1 %v3638_v59 }
  0x52   :  { %636 = vmatmul.f32.vlgmr.msra.gmra.mxu1 %v535_v33  ;;  %1376 = vrot.lane.b32.xlu1 %v3765_v10, %s3496_s5 }
  0x54   :  { %491 = vmatmul.f32.gmra.mxu3 %v3613_v48 }
  0x58   :  { %669 = vmatmul.f32.vlgmr.msrb.gmra.mxu0 %v3690_v25  ;;  %461 = vmatmul.f32.gmra.mxu2 %v3663_v8 }
  0x5a   :  { %694 = vmatmul.f32.vlgmr.msrb.gmra.mxu1 %v3690_v25  ;;  %1673 = vrot.lane.b32.xlu1 %v3696_v29, %s3497_s16  ;;  %v704_v25 = vlaneseq }
  0x5c   :  { %495 = vmatmul.f32.gmra.mxu3 %v3663_v8  ;;  %v3791_v27 = vand.u32 127, %v704_v25 }
  0x5e   :  { %vm862_vm11 = vcmp.lt.s32.totalorder %v3791_v27, 16  ;;  %vm922_vm12 = vcmp.ge.s32.totalorder %v3791_v27, 16  ;;  %vm923_vm13 = vcmp.lt.s32.totalorder %v3791_v27, 32  ;;  %vm983_vm15 = vcmp.ge.s32.totalorder %v3791_v27, 32 }
  0x5f   :  { %v3310_v35 = vsel %vm862_vm11, 1.0, %v3494_v34  ;;  %vm924_vm14 = vmand %vm922_vm12, %vm923_vm13  ;;  %vm984_vm0 = vcmp.lt.s32.totalorder %v3791_v27, 48  ;;  %vm1044_vm1 = vcmp.ge.s32.totalorder %v3791_v27, 48  ;;  %vm1045_vm4 = vcmp.lt.s32.totalorder %v3791_v27, 64 }
  0x60   :  { %465 = vmatmul.f32.gmra.mxu2 %v3677_v19  ;;  %v3311_v36 = vsel %vm924_vm14, 1.0, %v3494_v34  ;;  %vm985_vm3 = vmand %vm983_vm15, %vm984_vm0 }
  0x61   :  { %v927_v38 = vmul.f32 0.0, %v3311_v36  ;;  %v3312_v39 = vsel %vm985_vm3, 1.0, %v3494_v34  ;;  %vm1046_vm5 = vmand %vm1044_vm1, %vm1045_vm4  ;;  %vm2192_vm1 = vcmask 523520  }
  0x62   :  { %1682 = vperm.xlu1 %3426, %v3696_v29   ;;  %v868_v29 = vmul.f32 0.0, %v3310_v35  ;;  %v988_v41 = vmul.f32 0.0, %v3312_v39  ;;  %v3313_v50 = vsel %vm1046_vm5, 1.0, %v3494_v34 }
  0x63   :  { %v1049_v51 = vmul.f32 0.0, %v3313_v50 }
  0x64   :  { %499 = vmatmul.f32.gmra.mxu3 %v3677_v19  ;;  %v508_v19 = vperm.slane %v30_v6, 0  ;;  %v937_v42 = vadd.f32 %v3311_v36, %v868_v29  ;;  %v939_v44 = vadd.f32 %v927_v38, %v868_v29 }
  0x66   :  { %v1002_v57 = vadd.f32 %v988_v41, %v939_v44  ;;  %v1000_v46 = vadd.f32 %v3312_v39, %v939_v44 }
  0x6a   :  { %1685 = vperm.xlu1 %3426, %v3701_v30  }
  0x72   :  { %1679 = vrot.lane.b32.xlu1 %v3721_v47, %s3497_s16 }
  0x7b   :  { %v3796_v33 = vpop.permute.xlu2 %3417 }
  0x8d   :  { %v68_v37 = vpop.f32.mrf.mxu0 }
  0x8f   :  { %v112_v43 = vpop.f32.mrf.mxu1  ;;  %v3787_v26 = vpop.permute.xlu1 %3406 }
  0x90   :  { %v113_v58 = vadd.f32 %v112_v43, %v68_v37  ;;  %v935_v43 = vadd.f32 %v3310_v35, %v927_v38 }
  0x92   :  { %v76_v49 = vpop.f32.mrf.mxu2 }
  0x95   :  { %v211_v52 = vpop.f32.mrf.mxu0 }
  0x96   :  { %v116_v53 = vpop.f32.mrf.mxu3 }
  0x97   :  { %v239_v56 = vpop.f32.mrf.mxu1  ;;  %v117_v2 = vadd.f32 %v116_v53, %v76_v49  ;;  %v3412_v55 = vpop.permute.xlu1 %3411  ;;  %v998_v53 = vadd.f32 %v988_v41, %v937_v42 }
  0x9a   :  { %v144_v48 = vpop.f32.mrf.mxu2 }
  0x9b   :  { %v145_v59 = vadd.f32 %v144_v48, %v113_v58  ;;  %v3414_v48 = vunpack.i.h.bf16 %v3412_v55 }
  0x9d   :  { %v215_v60 = vpop.f32.mrf.mxu0 }
  0x9e   :  { %v175_v61 = vpop.f32.mrf.mxu3 }
  0x9f   :  { %v176_v62 = vadd.f32 %v175_v61, %v145_v59  ;;  %v243_v63 = vpop.f32.mrf.mxu1  ;;  %v3413_v59 = vunpack.i.l.bf16 %v3412_v55  ;;  %v3408_v61 = vunpack.i.l.bf16 %v3787_v26 }
  0xa1   :  { %v212_v0 = vadd.f32 %v211_v52, %v176_v62  ;;  %v1063_v52 = vadd.f32 %v3313_v50, %v1002_v57  ;;  %v3423_v62 = vpop.permute.xlu2 %3422 }
  0xa2   :  { %v149_v1 = vpop.f32.mrf.mxu2 }
  0xa3   :  { %v3754_v3 = vadd.f32 %v239_v56, %v212_v0  ;;  %v150_v4 = vadd.f32 %v149_v1, %v117_v2  ;;  %v1061_v56 = vadd.f32 %v1049_v51, %v1000_v46 }
  0xa5   :  { %1067 = vrot.lane.b32.xlu0 %v3754_v3, %s3495_s4  ;;  %v3758_v5 = vpop.f32.mrf.mxu0  ;;  %v3811_v0 = vand.u32 4294901760, %v1061_v56 }
  0xa6   :  { %v181_v7 = vpop.f32.mrf.mxu3 }
  0xa7   :  { %v182_v8 = vadd.f32 %v181_v7, %v150_v4  ;;  %v3763_v9 = vpop.f32.mrf.mxu1  ;;  %v996_v4 = vadd.f32 %v988_v41, %v935_v43  ;;  %v1059_v7 = vadd.f32 %v1049_v51, %v998_v53 }
  0xa9   :  { %v216_v11 = vadd.f32 %v215_v60, %v182_v8  ;;  %v3409_v60 = vunpack.i.h.bf16 %v3787_v26  ;;  %v1149_v8 = vsub.f32 %v1061_v56, %v3811_v0  ;;  %v1057_v35 = vadd.f32 %v1049_v51, %v996_v4 }
  0xaa   :  { %v3831_v29 = vand.u32 4294901760, %v1059_v7 }
  0xab   :  { %v3769_v12 = vadd.f32 %v243_v63, %v216_v11  ;;  %v3809_v63 = vand.u32 4294901760, %v1063_v52  ;;  %v1150_v36 = vand.u32 4294901760, %v1149_v8  ;;  %v3842_v50 = vand.u32 4294901760, %v1057_v35 }
  0xac   :  { %v3845_v51 = vsub.f32 %v1059_v7, %v3831_v29 }
  0xad   :  { %1069 = vrot.lane.b32.xlu0 %v3769_v12, %s3495_s4  ;;  %v3773_v13 = vpop.f32.mrf.mxu0  ;;  %v1137_v6 = vsub.f32 %v1063_v52, %v3809_v63  ;;  %1245 = vmatpush.msra.mxu1 %v3809_v63  ;;  %v1151_v42 = vsub.f32 %v1149_v8, %v1150_v36  ;;  %v3852_v46 = vsub.f32 %v1057_v35, %v3842_v50 }
  0xae   :  { %1096 = vmatpush.msra.mxu2 %v3809_v63 }
  0xaf   :  { %v3775_v14 = vpop.f32.mrf.mxu1  ;;  %1203 = vmatpush.msra.mxu0 %v1137_v6  ;;  %1247 = vmatpush.msra.mxu1 %v3809_v63  ;;  %v1152_v55 = vand.u32 4294901760, %v1151_v42  ;;  %v3876_v56 = vand.u32 4294901760, %v3852_v46 }
  0xb0   :  { %1098 = vmatpush.msra.mxu2 %v3809_v63 }
  0xb1   :  { %1206 = vmatpush.msra.mxu0 %v1137_v6  ;;  %1249 = vmatpush.msra.mxu1 %v3811_v0 }
  0xb2   :  { %1100 = vmatpush.msra.mxu2 %v3811_v0 }
  0xb3   :  { %1209 = vmatpush.msra.mxu0 %v1149_v8  ;;  %1251 = vmatpush.msra.mxu1 %v3811_v0 }
  0xb4   :  { %1102 = vmatpush.msra.mxu2 %v3811_v0 }
  0xb5   :  { %v3779_v15 = vpop.f32.mrf.mxu0  ;;  %1212 = vmatpush.msra.mxu0 %v1149_v8  ;;  %1253 = vmatpush.msra.mxu1 %v3831_v29 }
  0xb6   :  { %1104 = vmatpush.msra.mxu2 %v3831_v29 }
  0xb7   :  { %v3781_v16 = vpop.f32.mrf.mxu1  ;;  %1215 = vmatpush.msra.mxu0 %v3845_v51  ;;  %1255 = vmatpush.msra.mxu1 %v3831_v29 }
  0xb8   :  { %1106 = vmatpush.msra.mxu2 %v3831_v29 }
  0xb9   :  { %1218 = vmatpush.msra.mxu0 %v3845_v51  ;;  %1257 = vmatpush.msra.mxu1 %v3842_v50 }
  0xba   :  { %1108 = vmatpush.msra.mxu2 %v3842_v50 }
  0xbb   :  { %1221 = vmatpush.msra.mxu0 %v3852_v46  ;;  %1259 = vmatpush.msra.mxu1 %v3842_v50 }
  0xbc   :  { %1110 = vmatpush.msra.mxu2 %v3842_v50 }
  0xbd   :  { %v3783_v17 = vpop.f32.mrf.mxu0  ;;  %1224 = vmatpush.msra.mxu0 %v3852_v46 }
  0xbf   :  { %v3785_v18 = vpop.f32.mrf.mxu1  ;;  %1408 = vmatpush.msrb.mxu0 %v3831_v29 }
  0xc1   :  { %1410 = vmatpush.msrb.mxu0 %v3831_v29 }
  0xc3   :  { %1412 = vmatpush.msrb.mxu0 %v3842_v50 }
  0xc5   :  { %v539_v20 = vpop.f32.mrf.mxu0  ;;  %1414 = vmatpush.msrb.mxu0 %v3842_v50 }
  0xc6   :  { %v540_v21 = vadd.f32 %v539_v20, %v508_v19  ;;  %v3425_v20 = vunpack.i.h.bf16 %v3423_v62 }
  0xc7   :  { %v580_v22 = vpop.f32.mrf.mxu1 }
  0xc8   :  { %v581_v23 = vadd.f32 %v580_v22, %v540_v21  ;;  %v3424_v21 = vunpack.i.l.bf16 %v3423_v62  ;;  %v3420_v22 = vunpack.i.h.bf16 %v3796_v33 }
  0xcd   :  { %v610_v28 = vpop.f32.mrf.mxu0 }
  0xce   :  { %v611_v31 = vadd.f32 %v610_v28, %v581_v23  ;;  %v3419_v23 = vunpack.i.l.bf16 %v3796_v33 }
  0xcf   :  { %v637_v32 = vpop.f32.mrf.mxu1 }
  0xd0   :  { %v638_v40 = vadd.f32 %v637_v32, %v611_v31  ;;  %v1138_v31 = vand.u32 4294901760, %v1137_v6 }
  0xd2   :  { %v1139_v39 = vsub.f32 %v1137_v6, %v1138_v31  ;;  %1284 = vmatpush.msrb.mxu2 %v1138_v31 }
  0xd4   :  { %v1140_v44 = vand.u32 4294901760, %v1139_v39  ;;  %1288 = vmatpush.msrb.mxu2 %v1138_v31 }
  0xd5   :  { %v670_v54 = vpop.f32.mrf.mxu0 }
  0xd6   :  { %v671_v37 = vadd.f32 %v670_v54, %v638_v40  ;;  %1141 = vmatpush.msra.mxu3 %v1140_v44  ;;  %1292 = vmatpush.msrb.mxu2 %v1150_v36 }
  0xd7   :  { %v695_v49 = vpop.f32.mrf.mxu1 }
  0xd8   :  { %v696_v58 = vadd.f32 %v695_v49, %v671_v37  ;;  %1147 = vmatpush.msra.mxu3 %v1140_v44  ;;  %v1162_v49 = vand.u32 4294901760, %v3845_v51  ;;  %1296 = vmatpush.msrb.mxu2 %v1150_v36 }
  0xda   :  { %v3813_v1 = vperm.slane %v696_v58, 0  ;;  %v3815_v2 = vperm.slane %v696_v58, 1  ;;  %1153 = vmatpush.msra.mxu3 %v1152_v55  ;;  %v1163_v52 = vsub.f32 %v3845_v51, %v1162_v49  ;;  %1300 = vmatpush.msrb.mxu2 %v1162_v49  ;;  %v1175_v58 = vsub.f32 %v3852_v46, %v3876_v56 }
  0xdc   :  { %v755_v11 = vmul.f32 %v3413_v59, %v3813_v1  ;;  %v810_v19 = vmul.f32 %v3414_v48, %v3815_v2  ;;  %v754_v24 = vmul.f32 %v3408_v61, %v3813_v1  ;;  %v809_v26 = vmul.f32 %v3409_v60, %v3815_v2  ;;  %1159 = vmatpush.msra.mxu3 %v1152_v55  ;;  %v3893_v48 = vpop.f32.mrf.mxu2  ;;  %v3895_v59 = vpop.f32.mrf.mxu3 }
  0xdd   :  { %v757_v33 = vmul.f32 %v3424_v21, %v3813_v1  ;;  %v812_v38 = vmul.f32 %v3425_v20, %v3815_v2  ;;  %v756_v40 = vmul.f32 %v3419_v23, %v3813_v1  ;;  %v811_v41 = vmul.f32 %v3420_v22, %v3815_v2  ;;  %1304 = vmatpush.msrb.mxu2 %v1162_v49 }
  0xde   :  { %v814_v28 = vadd.f32 %v810_v19, %v755_v11  ;;  %v813_v32 = vadd.f32 %v809_v26, %v754_v24  ;;  %v719_v37 = vmul.f32 0.0, %v3813_v1  ;;  %v1164_v53 = vand.u32 4294901760, %v1163_v52 }
  0xdf   :  { %v816_v54 = vadd.f32 %v812_v38, %v757_v33  ;;  %v815_v57 = vadd.f32 %v811_v41, %v756_v40  ;;  %1308 = vmatpush.msrb.mxu2 %v3876_v56  ;;  %v773_v60 = vmul.f32 0.0, %v3815_v2  ;;  %v1377_v41 = vpop.permute.xlu1 %1376 }
  0xe0   :  { %1361 = vrot.lane.b32.xlu2 %v814_v28, %s3496_s5  ;;  %1359 = vrot.lane.b32.xlu0 %v813_v32, %s3496_s5  ;;  %v776_v43 = vadd.f32 %v3815_v2, %v719_v37 }
  0xe1   :  { %1165 = vmatpush.msra.mxu3 %v1164_v53  ;;  %1465 = vmatpush.msrb.mxu1 %v1164_v53 }
  0xe2   :  { %1312 = vmatpush.msrb.mxu2 %v3876_v56 }
  0xe3   :  { %1171 = vmatpush.msra.mxu3 %v1164_v53  ;;  %1471 = vmatpush.msrb.mxu1 %v1164_v53 }
  0xe4   :  { %v341_v6 = vpop.f32.mrf.mxu3 }
  0xe8   :  { %1365 = vrot.lane.b32.xlu2 %v816_v54, %s3496_s5  ;;  %1363 = vrot.lane.b32.xlu0 %v815_v57, %s3496_s5  ;;  %v1674_v57 = vpop.permute.xlu1 %1673 }
  0xe9   :  { %1694 = vperm.xlu1 %3426, %v1674_v57  }
  0xec   :  { %v345_v31 = vpop.f32.mrf.mxu3 }
  0xf0   :  { %1675 = vrot.lane.b32.xlu2 %v3701_v30, %s3497_s16  ;;  %v1176_v30 = vand.u32 4294901760, %v1175_v58 }
  0xf2   :  { %1177 = vmatpush.msra.mxu3 %v1176_v30  ;;  %1477 = vmatpush.msrb.mxu1 %v1176_v30 }
  0xf4   :  { %1183 = vmatpush.msra.mxu3 %v1176_v30  ;;  %1483 = vmatpush.msrb.mxu1 %v1176_v30  ;;  %v349_v33 = vpop.f32.mrf.mxu3 }
  0xf6   :  { %1331 = vmatpush.msrb.mxu3 %v3809_v63 }
  0xf8   :  { %1677 = vrot.lane.b32.xlu2 %v3716_v45, %s3497_s16  ;;  %1333 = vmatpush.msrb.mxu3 %v3809_v63  ;;  %v295_v63 = vpop.f32.mrf.mxu2 }
  0xf9   :  { %v342_v40 = vadd.f32 %v341_v6, %v295_v63 }
  0xfa   :  { %1335 = vmatpush.msrb.mxu3 %v3811_v0 }
  0xfb   :  { %v379_v42 = vadd.f32 %v3773_v13, %v342_v40 }
  0xfc   :  { %1337 = vmatpush.msrb.mxu3 %v3811_v0  ;;  %v488_v39 = vpop.f32.mrf.mxu3 }
  0xfe   :  { %1339 = vmatpush.msrb.mxu3 %v3831_v29 }
 0x100   :  { %1691 = vperm.xlu2 %3428, %v3721_v47   ;;  %1341 = vmatpush.msrb.mxu3 %v3831_v29  ;;  %v775_v47 = vadd.f32 %v773_v60, %v3813_v1  ;;  %v303_v21 = vpop.f32.mrf.mxu2 }
 0x101   :  { %v346_v37 = vadd.f32 %v345_v31, %v303_v21 }
 0x102   :  { %1343 = vmatpush.msrb.mxu3 %v3842_v50 }
 0x104   :  { %1345 = vmatpush.msrb.mxu3 %v3842_v50  ;;  %v492_v54 = vpop.f32.mrf.mxu3 }
 0x108   :  { %v311_v36 = vpop.f32.mrf.mxu2 }
 0x109   :  { %v350_v53 = vadd.f32 %v349_v33, %v311_v36 }
 0x110   :  { %v454_v38 = vpop.f32.mrf.mxu2 }
 0x117   :  { %v1068_v61 = vpop.permute.xlu0 %1067 }
 0x118   :  { %v1073_v62 = vsel %vm509_vm2, %v3754_v3, %v1068_v61  ;;  %v458_v44 = vpop.f32.mrf.mxu2 }
 0x119   :  { %v1075_v0 = vmul.f32 %v1073_v62, %v775_v47 }
 0x11b   :  { %v1078_v4 = vmul.f32 %v3765_v10, %v1075_v0 }
 0x11d   :  { %v1082_v7 = vsel %vm1080_vm6, %v1078_v4, 0 }
 0x11e   :  { %v1111_v8 = vand.u32 4294901760, %v1082_v7 }
 0x11f   :  { %v1070_v11 = vpop.permute.xlu0 %1069 }
 0x120   :  { %v1074_v19 = vsel %vm509_vm2, %v3769_v12, %v1070_v11  ;;  %1185 = vmatmul.f32.vlgmr.msra.gmra.mxu3 %v1111_v8  ;;  %v1112_v2 = vsub.f32 %v1082_v7, %v1111_v8 }
 0x121   :  { %v1076_v20 = vmul.f32 %v1074_v19, %v776_v43  ;;  %1559 = vmatpush.msra.mxu3 %v3831_v29 }
 0x122   :  { %1227 = vmatmul.f32.vlgmr.msra.gmra.mxu0 %v1112_v2  ;;  %v1113_v1 = vand.u32 4294901760, %v1112_v2 }
 0x123   :  { %v1079_v22 = vmul.f32 %v3765_v10, %v1076_v20  ;;  %1561 = vmatpush.msra.mxu3 %v3831_v29  ;;  %1606 = vmatpush.msra.mxu0 %v1162_v49 }
 0x124   :  { %1263 = vmatmul.f32.vlgmr.msra.gmra.mxu1 %v1113_v1  ;;  %v1114_v23 = vsub.f32 %v1112_v2, %v1113_v1 }
 0x125   :  { %v1085_v24 = vsel %vm1080_vm6, %v1079_v22, 0  ;;  %1563 = vmatpush.msra.mxu3 %v3842_v50  ;;  %1649 = vmatpush.msra.mxu1 %v3831_v29 }
 0x126   :  { %v1115_v26 = vand.u32 4294901760, %v1114_v23  ;;  %v1119_v28 = vand.u32 4294901760, %v1085_v24  ;;  %1610 = vmatpush.msra.mxu0 %v1162_v49  ;;  %v462_v49 = vpop.f32.mrf.mxu2 }
 0x127   :  { %1565 = vmatpush.msra.mxu3 %v3842_v50  ;;  %1651 = vmatpush.msra.mxu1 %v3831_v29 }
 0x128   :  { %1116 = vmatmul.f32.vlgmr.msra.gmra.mxu2 %v1115_v26  ;;  %1189 = vmatmul.f32.gmra.mxu3 %v1119_v28  ;;  %v1120_v10 = vsub.f32 %v1085_v24, %v1119_v28 }
 0x129   :  { %1515 = vmatpush.msra.mxu2 %v3845_v51  ;;  %1653 = vmatpush.msra.mxu1 %v3842_v50 }
 0x12a   :  { %1232 = vmatmul.f32.gmra.mxu0 %v1120_v10  ;;  %v1121_v32 = vand.u32 4294901760, %v1120_v10 }
 0x12b   :  { %1518 = vmatpush.msra.mxu2 %v3845_v51  ;;  %1655 = vmatpush.msra.mxu1 %v3842_v50  ;;  %v338_v50 = vadd.f32 %v3895_v59, %v3893_v48  ;;  %v419_v51 = vadd.f32 %v3775_v14, %v379_v42  ;;  %v496_v48 = vpop.f32.mrf.mxu3  ;;  %v3928_v59 = vpop.permute.xlu1 %1682  ;;  %v389_v14 = vadd.f32 %v3783_v17, %v350_v53 }
 0x12c   :  { %1269 = vmatmul.f32.gmra.mxu1 %v1121_v32  ;;  %v1122_v35 = vsub.f32 %v1120_v10, %v1121_v32  ;;  %1614 = vmatpush.msra.mxu0 %v3876_v56  ;;  %vm1705_vm7 = vcmp.eq.s32.totalorder %v3791_v27, %v3928_v59 }
 0x12d   :  { %1521 = vmatpush.msra.mxu2 %v3852_v46  ;;  %v374_v55 = vadd.f32 %v3758_v5, %v338_v50 }
 0x12e   :  { %v1123_v29 = vand.u32 4294901760, %v1122_v35  ;;  %1618 = vmatpush.msra.mxu0 %v3876_v56  ;;  %v384_v56 = vadd.f32 %v3779_v15, %v346_v37  ;;  %v466_v63 = vpop.f32.mrf.mxu2 }
 0x12f   :  { %1524 = vmatpush.msra.mxu2 %v3852_v46  ;;  %v459_v46 = vadd.f32 %v458_v44, %v419_v51  ;;  %v413_v43 = vadd.f32 %v3763_v9, %v374_v55  ;;  %v431_v9 = vadd.f32 %v3785_v18, %v389_v14 }
 0x130   :  { %1124 = vmatmul.f32.gmra.mxu2 %v1123_v29  ;;  %1347 = vmatmul.f32.vlgmr.msrb.gmra.mxu3 %v1111_v8  ;;  %v425_v60 = vadd.f32 %v3781_v16, %v384_v56 }
 0x131   :  { %v493_v13 = vadd.f32 %v492_v54, %v459_v46  ;;  %v455_v58 = vadd.f32 %v454_v38, %v413_v43  ;;  %v467_v7 = vadd.f32 %v466_v63, %v431_v9 }
 0x132   :  { %v463_v0 = vadd.f32 %v462_v49, %v425_v60 }
 0x133   :  { %v489_v5 = vadd.f32 %v488_v39, %v455_v58  ;;  %v3934_v6 = vpop.permute.xlu1 %1685  ;;  %v500_v11 = vpop.f32.mrf.mxu3 }
 0x134   :  { %v497_v2 = vadd.f32 %v496_v48, %v463_v0  ;;  %v501_v18 = vadd.f32 %v500_v11, %v467_v7  ;;  %vm1706_vm9 = vcmp.eq.s32.totalorder %v3791_v27, %v3934_v6 }
 0x138   :  { %1314 = vmatmul.f32.vlgmr.msrb.gmra.mxu2 %v1111_v8  ;;  %1351 = vmatmul.f32.gmra.mxu3 %v1119_v28 }
 0x13a   :  { %v1362_v52 = vpop.permute.xlu2 %1361 }
 0x13b   :  { %v1372_v30 = vmul.f32 %v1362_v52, %v493_v13  ;;  %v1680_v31 = vpop.permute.xlu1 %1679 }
 0x13c   :  { %1703 = vperm.xlu1 %3426, %v1680_v31  }
 0x13d   :  { %v1380_v61 = vmul.f32 %v1377_v41, %v1372_v30 }
 0x13f   :  { %v1387_v4 = vsel %vm509_vm2, %v1380_v61, 0 }
 0x140   :  { %1318 = vmatmul.f32.gmra.mxu2 %v1119_v28  ;;  %v1423_v19 = vand.u32 4294901760, %v1387_v4 }
 0x142   :  { %v1366_v16 = vpop.permute.xlu2 %1365  ;;  %v1424_v23 = vsub.f32 %v1387_v4, %v1423_v19 }
 0x143   :  { %v1374_v24 = vmul.f32 %v1366_v16, %v501_v18 }
 0x144   :  { %v1425_v36 = vand.u32 4294901760, %v1424_v23 }
 0x145   :  { %v1382_v29 = vmul.f32 %v1377_v41, %v1374_v24 }
 0x146   :  { %v1426_v33 = vsub.f32 %v1424_v23, %v1425_v36 }
 0x147   :  { %v1393_v39 = vsel %vm509_vm2, %v1382_v29, 0 }
 0x148   :  { %v1439_v40 = vand.u32 4294901760, %v1393_v39  ;;  %v1427_v42 = vand.u32 4294901760, %v1426_v33  ;;  %v3965_v33 = vsel %vm1706_vm9, 1.0, %v3494_v34 }
 0x14a   :  { %v1440_v51 = vsub.f32 %v1393_v39, %v1439_v40  ;;  %v1676_v43 = vpop.permute.xlu2 %1675 }
 0x14b   :  { %1697 = vperm.xlu2 %3428, %v1676_v43  }
 0x14c   :  { %v1441_v55 = vand.u32 4294901760, %v1440_v51 }
 0x152   :  { %v1360_v47 = vpop.permute.xlu0 %1359  ;;  %v1678_v11 = vpop.permute.xlu2 %1677 }
 0x153   :  { %v1371_v62 = vmul.f32 %v1360_v47, %v489_v5 }
 0x155   :  { %v1379_v15 = vmul.f32 %v1377_v41, %v1371_v62 }
 0x157   :  { %v1384_v8 = vsel %vm509_vm2, %v1379_v15, 0 }
 0x158   :  { %v1415_v17 = vand.u32 4294901760, %v1384_v8 }
 0x15a   :  { %v1416_v20 = vsub.f32 %v1384_v8, %v1415_v17  ;;  %v1364_v1 = vpop.permute.xlu0 %1363  ;;  %1485 = vmatmul.f32.vlgmr.msrb.gmra.mxu1 %v1415_v17  ;;  %v3973_v43 = vpop.permute.xlu2 %1691 }
 0x15b   :  { %v1373_v21 = vmul.f32 %v1364_v1, %v497_v2  ;;  %vm1708_vm10 = vcmp.eq.s32.totalorder %v3791_v27, %v3973_v43 }
 0x15c   :  { %1527 = vmatmul.f32.vlgmr.msra.gmra.mxu2 %v1416_v20  ;;  %v1417_v22 = vand.u32 4294901760, %v1416_v20 }
 0x15d   :  { %v1381_v26 = vmul.f32 %v1377_v41, %v1373_v21  ;;  %v1442_v41 = vsub.f32 %v1440_v51, %v1441_v55 }
 0x15e   :  { %1569 = vmatmul.f32.vlgmr.msra.gmra.mxu3 %v1417_v22  ;;  %v1418_v28 = vsub.f32 %v1416_v20, %v1417_v22 }
 0x15f   :  { %v1390_v10 = vsel %vm509_vm2, %v1381_v26, 0  ;;  %v1443_v57 = vand.u32 4294901760, %v1442_v41 }
 0x160   :  { %v1431_v32 = vand.u32 4294901760, %v1390_v10  ;;  %v1419_v35 = vand.u32 4294901760, %v1418_v28 }
 0x162   :  { %1420 = vmatmul.f32.vlgmr.msrb.gmra.mxu0 %v1419_v35  ;;  %1489 = vmatmul.f32.gmra.mxu1 %v1423_v19  ;;  %v1432_v38 = vsub.f32 %v1390_v10, %v1431_v32 }
 0x164   :  { %1532 = vmatmul.f32.gmra.mxu2 %v1424_v23  ;;  %v1433_v44 = vand.u32 4294901760, %v1432_v38 }
 0x166   :  { %1575 = vmatmul.f32.gmra.mxu3 %v1425_v36  ;;  %v1434_v50 = vsub.f32 %v1432_v38, %v1433_v44 }
 0x168   :  { %v1435_v54 = vand.u32 4294901760, %v1434_v50 }
 0x16a   :  { %1428 = vmatmul.f32.gmra.mxu0 %v1427_v42  ;;  %1493 = vmatmul.f32.gmra.mxu1 %v1431_v32 }
 0x16c   :  { %1537 = vmatmul.f32.gmra.mxu2 %v1432_v38 }
 0x16e   :  { %1581 = vmatmul.f32.gmra.mxu3 %v1433_v44  ;;  %v1744_v44 = vsel %vm1739_vm8, %v3965_v33, 0 }
 0x172   :  { %1436 = vmatmul.f32.gmra.mxu0 %v1435_v54  ;;  %1497 = vmatmul.f32.gmra.mxu1 %v1439_v40  ;;  %v1791_v54 = vsub.f32 %v1744_v44, %v1744_v44 }
 0x174   :  { %1542 = vmatmul.f32.gmra.mxu2 %v1440_v51 }
 0x176   :  { %1587 = vmatmul.f32.gmra.mxu3 %v1441_v55 }
 0x17a   :  { %1444 = vmatmul.f32.gmra.mxu0 %v1443_v57  ;;  %1657 = vmatmul.f32.vlgmr.msra.gmra.mxu1 %v1415_v17 }
 0x182   :  { %1620 = vmatmul.f32.vlgmr.msra.gmra.mxu0 %v1415_v17  ;;  %1661 = vmatmul.f32.gmra.mxu1 %v1423_v19 }
 0x18a   :  { %1624 = vmatmul.f32.gmra.mxu0 %v1423_v19  ;;  %1665 = vmatmul.f32.gmra.mxu1 %v1431_v32 }
 0x192   :  { %1628 = vmatmul.f32.gmra.mxu0 %v1431_v32  ;;  %1669 = vmatmul.f32.gmra.mxu1 %v1439_v40  ;;  %v3958_v32 = vsel %vm1705_vm7, 1.0, %v3494_v34 }
 0x193   :  { %v1741_v35 = vsel %vm1739_vm8, %v3958_v32, 0 }
 0x194   :  { %v1783_v36 = vsub.f32 %v1741_v35, %v1741_v35 }
 0x19a   :  { %1632 = vmatmul.f32.gmra.mxu0 %v1439_v40  ;;  %v1784_v40 = vand.u32 4294901760, %v1783_v36 }
 0x19c   :  { %v1785_v51 = vsub.f32 %v1783_v36, %v1784_v40 }
 0x19f   :  { %v1228_v52 = vpop.f32.mrf.mxu0 }
 0x1a1   :  { %v1264_v13 = vpop.f32.mrf.mxu1 }
 0x1a3   :  { %v1186_v46 = vpop.f32.mrf.mxu3 }
 0x1a7   :  { %v1233_v48 = vpop.f32.mrf.mxu0 }
 0x1a9   :  { %v1270_v60 = vpop.f32.mrf.mxu1 }
 0x1ab   :  { %v1117_v37 = vpop.f32.mrf.mxu2  ;;  %v1190_v49 = vpop.f32.mrf.mxu3 }
 0x1ac   :  { %v1187_v5 = vadd.f32 %v1186_v46, %v1117_v37 }
 0x1ae   :  { %v1229_v9 = vadd.f32 %v1228_v52, %v1187_v5  ;;  %v1792_v52 = vand.u32 4294901760, %v1791_v54 }
 0x1b0   :  { %v1265_v4 = vadd.f32 %v1264_v13, %v1229_v9 }
 0x1b3   :  { %v1125_v53 = vpop.f32.mrf.mxu2  ;;  %v1348_v58 = vpop.f32.mrf.mxu3 }
 0x1b4   :  { %v1191_v56 = vadd.f32 %v1190_v49, %v1125_v53  ;;  %v1786_v49 = vand.u32 4294901760, %v1785_v51 }
 0x1b6   :  { %v1234_v14 = vadd.f32 %v1233_v48, %v1191_v56  ;;  %v3978_v56 = vsel %vm1708_vm10, 1.0, %v3494_v34 }
 0x1b8   :  { %v1271_v61 = vadd.f32 %v1270_v60, %v1234_v14  ;;  %v1750_v60 = vsel %vm1739_vm8, %v3978_v56, 0 }
 0x1bb   :  { %v1315_v30 = vpop.f32.mrf.mxu2  ;;  %v1352_v63 = vpop.f32.mrf.mxu3 }
 0x1bc   :  { %v1316_v15 = vadd.f32 %v1315_v30, %v1265_v4 }
 0x1be   :  { %v1349_v7 = vadd.f32 %v1348_v58, %v1316_v15  ;;  %v1793_v58 = vsub.f32 %v1791_v54, %v1792_v52 }
 0x1c3   :  { %v1319_v47 = vpop.f32.mrf.mxu2 }
 0x1c4   :  { %v1320_v62 = vadd.f32 %v1319_v47, %v1271_v61  ;;  %v1794_v61 = vand.u32 4294901760, %v1793_v58 }
 0x1c6   :  { %v1353_v0 = vadd.f32 %v1352_v63, %v1320_v62  ;;  %v1695_v62 = vpop.permute.xlu1 %1694  ;;  %v1807_v63 = vsub.f32 %v1750_v60, %v1750_v60 }
 0x1c7   :  { %vm1709_vm12 = vcmp.eq.s32.totalorder %v3791_v27, %v1695_v62 }
 0x1c8   :  { %1733 = vrot.lane.b32.xlu0 %v1353_v0, %s3495_s4  ;;  %v3995_v15 = vsel %vm1709_vm12, 1.0, %v3494_v34 }
 0x1d0   :  { %1731 = vrot.lane.b32.xlu0 %v1349_v7, %s3495_s4  ;;  %v1808_v7 = vand.u32 4294901760, %v1807_v63 }
 0x1d7   :  { %v1486_v8 = vpop.f32.mrf.mxu1 }
 0x1d8   :  { %1688 = vperm.xlu0 %3427, %v3716_v45  }
 0x1df   :  { %v1421_v17 = vpop.f32.mrf.mxu0  ;;  %v3942_v19 = vpop.f32.mrf.mxu1 }
 0x1e0   :  { %1700 = vperm.xlu0 %3427, %v1678_v11   ;;  %v1487_v1 = vadd.f32 %v1486_v8, %v1421_v17  ;;  %v1528_v22 = vpop.f32.mrf.mxu2  ;;  %v1698_v11 = vpop.permute.xlu2 %1697  ;;  %v1753_v17 = vsel %vm1739_vm8, %v3995_v15, 0 }
 0x1e1   :  { %v1570_v45 = vpop.f32.mrf.mxu3  ;;  %vm1710_vm13 = vcmp.eq.s32.totalorder %v3791_v27, %v1698_v11 }
 0x1e2   :  { %v1529_v23 = vadd.f32 %v1528_v22, %v1487_v1  ;;  %v1809_v1 = vsub.f32 %v1807_v63, %v1808_v7  ;;  %v1815_v22 = vsub.f32 %v1753_v17, %v1753_v17 }
 0x1e4   :  { %v1571_v24 = vadd.f32 %v1570_v45, %v1529_v23  ;;  %v4003_v23 = vsel %vm1710_vm13, 1.0, %v3494_v34  ;;  %v1810_v45 = vand.u32 4294901760, %v1809_v1 }
 0x1e7   :  { %v3944_v2 = vpop.f32.mrf.mxu0  ;;  %v3946_v16 = vpop.f32.mrf.mxu1 }
 0x1ef   :  { %v3948_v20 = vpop.f32.mrf.mxu0  ;;  %v3950_v18 = vpop.f32.mrf.mxu1 }
 0x1f7   :  { %v3952_v21 = vpop.f32.mrf.mxu0  ;;  %v1658_v31 = vpop.f32.mrf.mxu1 }
 0x1ff   :  { %v1621_v26 = vpop.f32.mrf.mxu0 }
 0x200   :  { %v1622_v28 = vadd.f32 %v1621_v26, %v1571_v24  ;;  %v1816_v26 = vand.u32 4294901760, %v1815_v22 }
 0x202   :  { %v1659_v10 = vadd.f32 %v1658_v31, %v1622_v28  ;;  %v1756_v28 = vsel %vm1739_vm8, %v4003_v23, 0 }
 0x203   :  { %v1823_v31 = vsub.f32 %v1756_v28, %v1756_v28 }
 0x204   :  { %2164 = vrot.lane.b32.xlu0 %v1659_v10, %s3495_s4  ;;  %v1817_v10 = vsub.f32 %v1815_v22, %v1816_v26 }
 0x23a   :  { %v1734_v29 = vpop.permute.xlu0 %1733 }
 0x23b   :  { %v1738_v38 = vsel %vm509_vm2, %v3769_v12, %v1734_v29  ;;  %v1818_v29 = vand.u32 4294901760, %v1817_v10 }
 0x23c   :  { %v1778_v39 = vand.u32 4294901760, %v1738_v38 }
 0x23e   :  { %v1862_v42 = vsub.f32 %v1738_v38, %v1778_v39  ;;  %1779 = vmatpush.msrb.mxu2 %v1778_v39  ;;  %1982 = vmatpush.msrb.mxu1 %v1778_v39  ;;  %v1824_v38 = vand.u32 4294901760, %v1823_v31 }
 0x240   :  { %v1863_v50 = vand.u32 4294901760, %v1862_v42  ;;  %1922 = vmatpush.msrb.mxu0 %v1862_v42 }
 0x242   :  { %v1864_v55 = vsub.f32 %v1862_v42, %v1863_v50  ;;  %v1732_v41 = vpop.permute.xlu0 %1731  ;;  %v1825_v42 = vsub.f32 %v1823_v31, %v1824_v38 }
 0x243   :  { %v1737_v57 = vsel %vm509_vm2, %v3754_v3, %v1732_v41 }
 0x244   :  { %v1780_v46 = vand.u32 4294901760, %v1737_v57  ;;  %v1865_v37 = vand.u32 4294901760, %v1864_v55 }
 0x246   :  { %v1868_v53 = vsub.f32 %v1737_v57, %v1780_v46  ;;  %1781 = vmatpush.msrb.mxu2 %v1780_v46  ;;  %1866 = vmatpush.msrb.mxu3 %v1865_v37 }
 0x247   :  { %1984 = vmatpush.msrb.mxu1 %v1780_v46  ;;  %1787 = vmatmul.f32.vlgmr.msrb.gmra.mxu2 %v1786_v49  ;;  %v4041_v49 = vpop.f32.mrf.mxu2 }
 0x248   :  { %1988 = vmatmul.f32.vlgmr.msrb.gmra.mxu1 %v1784_v40  ;;  %2051 = vmatpush.msra.mxu2 %v1863_v50  ;;  %v1869_v13 = vand.u32 4294901760, %v1868_v53  ;;  %v1826_v50 = vand.u32 4294901760, %v1825_v42 }
 0x249   :  { %1925 = vmatpush.msrb.mxu0 %v1868_v53 }
 0x24a   :  { %1928 = vmatmul.f32.vlgmr.msrb.gmra.mxu0 %v1783_v36  ;;  %2055 = vmatpush.msra.mxu2 %v1869_v13  ;;  %v3980_v30 = vpop.permute.xlu0 %1688  ;;  %v1870_v48 = vsub.f32 %v1868_v53, %v1869_v13  ;;  %v1704_v36 = vpop.permute.xlu1 %1703 }
 0x24b   :  { %vm1707_vm11 = vcmp.eq.s32.totalorder %v3791_v27, %v3980_v30  ;;  %vm1712_vm15 = vcmp.eq.s32.totalorder %v3791_v27, %v1704_v36 }
 0x24c   :  { %v3985_v14 = vsel %vm1707_vm11, 1.0, %v3494_v34  ;;  %v1871_v5 = vand.u32 4294901760, %v1870_v48  ;;  %v3321_v44 = vsel %vm1712_vm15, 1.0, %v3494_v34 }
 0x24d   :  { %v1747_v47 = vsel %vm1739_vm8, %v3985_v14, 0 }
 0x24e   :  { %1872 = vmatpush.msrb.mxu3 %v1871_v5  ;;  %v1799_v9 = vsub.f32 %v1747_v47, %v1747_v47 }
 0x24f   :  { %1795 = vmatmul.f32.gmra.mxu2 %v1794_v61  ;;  %3322 = vmatmul.msk.f32.vlgmr.msrb.gmra.mxu3 %vm1739_vm8, %v3958_v32  ;;  %v4056_v53 = vpop.f32.mrf.mxu2 }
 0x250   :  { %1994 = vmatmul.f32.gmra.mxu1 %v1792_v52  ;;  %2104 = vmatpush.msra.mxu3 %v1778_v39  ;;  %v1800_v0 = vand.u32 4294901760, %v1799_v9  ;;  %v4051_v52 = vpop.f32.mrf.mxu3 }
 0x252   :  { %1933 = vmatmul.f32.gmra.mxu0 %v1791_v54  ;;  %2106 = vmatpush.msra.mxu3 %v1780_v46  ;;  %v1801_v4 = vsub.f32 %v1799_v9, %v1800_v0  ;;  %v1701_v24 = vpop.permute.xlu0 %1700  ;;  %v1762_v54 = vsel %vm1739_vm8, %v3321_v44, 0 }
 0x253   :  { %vm1711_vm14 = vcmp.eq.s32.totalorder %v3791_v27, %v1701_v24  ;;  %v1839_v55 = vsub.f32 %v1762_v54, %v1762_v54 }
 0x254   :  { %v1802_v8 = vand.u32 4294901760, %v1801_v4  ;;  %v3320_v35 = vsel %vm1711_vm14, 1.0, %v3494_v34 }
 0x255   :  { %v1759_v39 = vsel %vm1739_vm8, %v3320_v35, 0  ;;  %v1840_v27 = vand.u32 4294901760, %v1839_v55 }
 0x256   :  { %v1831_v40 = vsub.f32 %v1759_v39, %v1759_v39 }
 0x257   :  { %1803 = vmatmul.f32.gmra.mxu2 %v1802_v8  ;;  %3323 = vmatmul.msk.f32.gmra.mxu3 %vm1739_vm8, %v3965_v33  ;;  %v1841_v46 = vsub.f32 %v1839_v55, %v1840_v27  ;;  %v4066_v48 = vpop.f32.mrf.mxu2 }
 0x258   :  { %2000 = vmatmul.f32.gmra.mxu1 %v1800_v0  ;;  %v1832_v51 = vand.u32 4294901760, %v1831_v40  ;;  %v4064_v58 = vpop.f32.mrf.mxu3 }
 0x259   :  { %v1842_v37 = vand.u32 4294901760, %v1841_v46 }
 0x25a   :  { %1938 = vmatmul.f32.gmra.mxu0 %v1799_v9  ;;  %v1833_v41 = vsub.f32 %v1831_v40, %v1832_v51 }
 0x25c   :  { %v1834_v57 = vand.u32 4294901760, %v1833_v41 }
 0x25f   :  { %1811 = vmatmul.f32.gmra.mxu2 %v1810_v45  ;;  %3324 = vmatmul.msk.f32.gmra.mxu3 %vm1739_vm8, %v3985_v14 }
 0x260   :  { %2006 = vmatmul.f32.gmra.mxu1 %v1808_v7  ;;  %v4073_v60 = vpop.f32.mrf.mxu3 }
 0x262   :  { %1943 = vmatmul.f32.gmra.mxu0 %v1807_v63 }
 0x267   :  { %1819 = vmatmul.f32.gmra.mxu2 %v1818_v29  ;;  %3325 = vmatmul.msk.f32.gmra.mxu3 %vm1739_vm8, %v3978_v56 }
 0x268   :  { %2012 = vmatmul.f32.gmra.mxu1 %v1816_v26 }
 0x26a   :  { %1948 = vmatmul.f32.gmra.mxu0 %v1815_v22 }
 0x26f   :  { %1827 = vmatmul.f32.gmra.mxu2 %v1826_v50  ;;  %3326 = vmatmul.msk.f32.gmra.mxu3 %vm1739_vm8, %v3995_v15 }
 0x270   :  { %2018 = vmatmul.f32.gmra.mxu1 %v1824_v38 }
 0x272   :  { %1953 = vmatmul.f32.gmra.mxu0 %v1823_v31 }
 0x277   :  { %1835 = vmatmul.f32.gmra.mxu2 %v1834_v57  ;;  %3327 = vmatmul.msk.f32.gmra.mxu3 %vm1739_vm8, %v4003_v23 }
 0x278   :  { %2024 = vmatmul.f32.gmra.mxu1 %v1832_v51 }
 0x27a   :  { %1958 = vmatmul.f32.gmra.mxu0 %v1831_v40 }
 0x27f   :  { %1843 = vmatmul.f32.gmra.mxu2 %v1842_v37  ;;  %3328 = vmatmul.msk.f32.gmra.mxu3 %vm1739_vm8, %v3320_v35 }
 0x280   :  { %2030 = vmatmul.f32.gmra.mxu1 %v1840_v27 }
 0x282   :  { %1963 = vmatmul.f32.gmra.mxu0 %v1839_v55 }
 0x287   :  { %3329 = vmatmul.msk.f32.gmra.mxu3 %vm1739_vm8, %v3321_v44  ;;  %3330 = vmatmul.msk.f32.vlgmr.msra.gmra.mxu2 %vm1739_vm8, %v3958_v32 }
 0x28f   :  { %3331 = vmatmul.msk.f32.gmra.mxu2 %vm1739_vm8, %v3965_v33  ;;  %3338 = vmatmul.msk.f32.vlgmr.msra.gmra.mxu3 %vm1739_vm8, %v3958_v32  ;;  %v4047_v32 = vpop.f32.mrf.mxu0 }
 0x297   :  { %3332 = vmatmul.msk.f32.gmra.mxu2 %vm1739_vm8, %v3985_v14  ;;  %3339 = vmatmul.msk.f32.gmra.mxu3 %vm1739_vm8, %v3965_v33  ;;  %v4049_v33 = vpop.f32.mrf.mxu1  ;;  %v4058_v13 = vpop.f32.mrf.mxu0 }
 0x29f   :  { %3333 = vmatmul.msk.f32.gmra.mxu2 %vm1739_vm8, %v3978_v56  ;;  %3340 = vmatmul.msk.f32.gmra.mxu3 %vm1739_vm8, %v3985_v14  ;;  %v4068_v14 = vpop.f32.mrf.mxu0 }
 0x2a7   :  { %3334 = vmatmul.msk.f32.gmra.mxu2 %vm1739_vm8, %v3995_v15  ;;  %3341 = vmatmul.msk.f32.gmra.mxu3 %vm1739_vm8, %v3978_v56  ;;  %v4060_v56 = vpop.f32.mrf.mxu1 }
 0x2af   :  { %3335 = vmatmul.msk.f32.gmra.mxu2 %vm1739_vm8, %v4003_v23  ;;  %3342 = vmatmul.msk.f32.gmra.mxu3 %vm1739_vm8, %v3995_v15  ;;  %v4070_v5 = vpop.f32.mrf.mxu1 }
 0x2b7   :  { %3336 = vmatmul.msk.f32.gmra.mxu2 %vm1739_vm8, %v3320_v35  ;;  %3343 = vmatmul.msk.f32.gmra.mxu3 %vm1739_vm8, %v4003_v23 }
 0x2bf   :  { %3337 = vmatmul.msk.f32.gmra.mxu2 %vm1739_vm8, %v3321_v44  ;;  %3344 = vmatmul.msk.f32.gmra.mxu3 %vm1739_vm8, %v3320_v35 }
 0x2c5   :  { %v1989_v9 = vpop.f32.mrf.mxu1 }
 0x2c7   :  { %3345 = vmatmul.msk.f32.gmra.mxu3 %vm1739_vm8, %v3321_v44  ;;  %v1929_v47 = vpop.f32.mrf.mxu0 }
 0x2ca   :  { %v1788_v61 = vpop.f32.mrf.mxu2 }
 0x2cd   :  { %v1995_v4 = vpop.f32.mrf.mxu1 }
 0x2cf   :  { %v1934_v0 = vpop.f32.mrf.mxu0 }
 0x2d2   :  { %v1796_v62 = vpop.f32.mrf.mxu2  ;;  %v1875_v63 = vpop.f32.mrf.mxu3 }
 0x2d3   :  { %v1876_v50 = vadd.f32 %v1875_v63, %v1788_v61 }
 0x2d5   :  { %v2001_v22 = vpop.f32.mrf.mxu1  ;;  %v1930_v55 = vadd.f32 %v1929_v47, %v1876_v50 }
 0x2d7   :  { %v1939_v8 = vpop.f32.mrf.mxu0  ;;  %v1990_v57 = vadd.f32 %v1989_v9, %v1930_v55 }
 0x2da   :  { %v1804_v15 = vpop.f32.mrf.mxu2  ;;  %v1879_v7 = vpop.f32.mrf.mxu3 }
 0x2db   :  { %v1880_v41 = vadd.f32 %v1879_v7, %v1796_v62 }
 0x2dd   :  { %v2007_v35 = vpop.f32.mrf.mxu1 }
 0x2df   :  { %v1944_v31 = vpop.f32.mrf.mxu0 }
 0x2e2   :  { %v1812_v11 = vpop.f32.mrf.mxu2  ;;  %v1883_v17 = vpop.f32.mrf.mxu3 }
 0x2e3   :  { %v1884_v1 = vadd.f32 %v1883_v17, %v1804_v15  ;;  %v1935_v15 = vadd.f32 %v1934_v0, %v1880_v41 }
 0x2e5   :  { %v1940_v23 = vadd.f32 %v1939_v8, %v1884_v1  ;;  %v2013_v9 = vpop.f32.mrf.mxu1 }
 0x2e7   :  { %v2002_v45 = vadd.f32 %v2001_v22, %v1940_v23  ;;  %v1949_v47 = vpop.f32.mrf.mxu0 }
 0x2ea   :  { %v1820_v24 = vpop.f32.mrf.mxu2  ;;  %v1887_v26 = vpop.f32.mrf.mxu3 }
 0x2eb   :  { %v1888_v28 = vadd.f32 %v1887_v26, %v1812_v11  ;;  %v1996_v11 = vadd.f32 %v1995_v4, %v1935_v15 }
 0x2ed   :  { %v1945_v10 = vadd.f32 %v1944_v31, %v1888_v28  ;;  %v2019_v55 = vpop.f32.mrf.mxu1 }
 0x2ef   :  { %v2008_v36 = vadd.f32 %v2007_v35, %v1945_v10  ;;  %v1954_v4 = vpop.f32.mrf.mxu0 }
 0x2f2   :  { %v1828_v29 = vpop.f32.mrf.mxu2  ;;  %v1891_v38 = vpop.f32.mrf.mxu3 }
 0x2f3   :  { %v1892_v62 = vadd.f32 %v1891_v38, %v1820_v24 }
 0x2f5   :  { %v1950_v0 = vadd.f32 %v1949_v47, %v1892_v62 }
 0x2fa   :  { %v1836_v39 = vpop.f32.mrf.mxu2  ;;  %v1895_v40 = vpop.f32.mrf.mxu3 }
 0x2fb   :  { %v1896_v50 = vadd.f32 %v1895_v40, %v1828_v29 }
 0x302   :  { %v1844_v42 = vpop.f32.mrf.mxu2  ;;  %v1899_v44 = vpop.f32.mrf.mxu3 }
 0x303   :  { %v1900_v24 = vadd.f32 %v1899_v44, %v1836_v39 }
 0x30a   :  { %v1903_v51 = vpop.f32.mrf.mxu3  ;;  %v2058_v54 = vpop.f32.mrf.mxu2 }
 0x30b   :  { %v2059_v27 = vadd.f32 %v2058_v54, %v1990_v57  ;;  %v2014_v54 = vadd.f32 %v2013_v9, %v1950_v0  ;;  %v1904_v39 = vadd.f32 %v1903_v51, %v1844_v42 }
 0x312   :  { %v2062_v46 = vpop.f32.mrf.mxu2  ;;  %v2109_v37 = vpop.f32.mrf.mxu3 }
 0x313   :  { %v4075_v8 = vadd.f32 %v2109_v37, %v2059_v27  ;;  %v2063_v17 = vadd.f32 %v2062_v46, %v1996_v11  ;;  %v1955_v27 = vadd.f32 %v1954_v4, %v1896_v50  ;;  %v1959_v37 = vpop.f32.mrf.mxu0  ;;  %v2165_v4 = vpop.permute.xlu0 %2164 }
 0x314   :  { %v1960_v11 = vadd.f32 %v1959_v37, %v1900_v24 }
 0x315   :  { %v2020_v38 = vadd.f32 %v2019_v55, %v1955_v27 }
 0x31a   :  { %v2066_v1 = vpop.f32.mrf.mxu2  ;;  %v2113_v22 = vpop.f32.mrf.mxu3 }
 0x31b   :  { %v2067_v23 = vadd.f32 %v2066_v1, %v2002_v45  ;;  %v4077_v26 = vadd.f32 %v2113_v22, %v2063_v17  ;;  %v2025_v1 = vpop.f32.mrf.mxu1 }
 0x31c   :  { %v2026_v44 = vadd.f32 %v2025_v1, %v1960_v11 }
 0x322   :  { %v2070_v28 = vpop.f32.mrf.mxu2  ;;  %v2117_v61 = vpop.f32.mrf.mxu3 }
 0x323   :  { %v2071_v63 = vadd.f32 %v2070_v28, %v2008_v36  ;;  %v4079_v31 = vadd.f32 %v2117_v61, %v2067_v23  ;;  %v1499_v36 = vadd.f32 %v3950_v18, %v3952_v21  ;;  %v1491_v23 = vadd.f32 %v3942_v19, %v3944_v2  ;;  %v1964_v61 = vpop.f32.mrf.mxu0 }
 0x324   :  { %v1965_v9 = vadd.f32 %v1964_v61, %v1904_v39  ;;  %v1495_v2 = vadd.f32 %v3946_v16, %v3948_v20  ;;  %v3462_v61 = vld [vmem:[%s4444_s3] sm:$0xff] }
 0x325   :  { %v1544_v29 = vadd.f32 %v4066_v48, %v1499_v36  ;;  %v1534_v48 = vadd.f32 %v4041_v49, %v1491_v23 }
 0x327   :  { %v1589_v18 = vadd.f32 %v4073_v60, %v1544_v29  ;;  %v1577_v19 = vadd.f32 %v4051_v52, %v1534_v48  ;;  %v3500_v48 = vmov 1  }
 0x328   :  { %3429 = vset.pattern.permute.xlu0 %v3500_v48  ;;  %3430 = vset.pattern.permute.xlu1 %v3500_v48 }
 0x329   :  { %v1634_v21 = vadd.f32 %v4068_v14, %v1589_v18  ;;  %v2031_v14 = vpop.f32.mrf.mxu1  ;;  %v1626_v60 = vadd.f32 %v4047_v32, %v1577_v19  ;;  %3431 = vset.pattern.permute.xlu2 %v3500_v48 }
 0x32a   :  { %v2074_v7 = vpop.f32.mrf.mxu2  ;;  %v2121_v10 = vpop.f32.mrf.mxu3  ;;  %v2032_v42 = vadd.f32 %v2031_v14, %v1965_v9 }
 0x32b   :  { %v4081_v35 = vadd.f32 %v2121_v10, %v2071_v63  ;;  %v2075_v45 = vadd.f32 %v2074_v7, %v2014_v54  ;;  %v1671_v47 = vadd.f32 %v4070_v5, %v1634_v21  ;;  %v1539_v5 = vadd.f32 %v4056_v53, %v1495_v2 }
 0x32c   :  { %v1663_v10 = vadd.f32 %v4049_v33, %v1626_v60 }
 0x32d   :  { %v1583_v16 = vadd.f32 %v4064_v58, %v1539_v5 }
 0x32f   :  { %v1630_v20 = vadd.f32 %v4058_v13, %v1583_v16 }
 0x331   :  { %v1667_v32 = vadd.f32 %v4060_v56, %v1630_v20 }
 0x332   :  { %v2078_v41 = vpop.f32.mrf.mxu2  ;;  %v2125_v57 = vpop.f32.mrf.mxu3 }
 0x333   :  { %v4083_v46 = vadd.f32 %v2125_v57, %v2075_v45  ;;  %v2079_v40 = vadd.f32 %v2078_v41, %v2020_v38 }
 0x335   :  { %2144 = vrot.lane.b32.xlu2 %v4083_v46, %s3499_s17 }
 0x33a   :  { %v2129_v15 = vpop.f32.mrf.mxu3  ;;  %v2082_v22 = vpop.f32.mrf.mxu2 }
 0x33b   :  { %v4090_v17 = vadd.f32 %v2129_v15, %v2079_v40  ;;  %v2083_v28 = vadd.f32 %v2082_v22, %v2026_v44 }
 0x33d   :  { %2146 = vrot.lane.b32.xlu0 %v4090_v17, %s3499_s17 }
 0x342   :  { %v2133_v63 = vpop.f32.mrf.mxu3  ;;  %v2086_v49 = vpop.f32.mrf.mxu2 }
 0x343   :  { %v4100_v62 = vadd.f32 %v2133_v63, %v2083_v28  ;;  %v2087_v51 = vadd.f32 %v2086_v49, %v2032_v42 }
 0x345   :  { %2148 = vrot.lane.b32.xlu1 %v4100_v62, %s3499_s17  ;;  %2170 = vrot.lane.b32.xlu0 %v1671_v47, %s3495_s4 }
 0x34a   :  { %v2137_v7 = vpop.f32.mrf.mxu3 }
 0x34b   :  { %v4111_v52 = vadd.f32 %v2137_v7, %v2087_v51 }
 0x34d   :  { %2166 = vrot.lane.b32.xlu1 %v1663_v10, %s3495_s4  ;;  %2150 = vrot.lane.b32.xlu2 %v4111_v52, %s3499_s17 }
 0x355   :  { %2168 = vrot.lane.b32.xlu2 %v1667_v32, %s3495_s4 }
 0x38f   :  { %v2145_v53 = vpop.permute.xlu2 %2144 }
 0x390   :  { %v2156_v0 = vadd.f32 %v2145_v53, %v4075_v8 }
 0x392   :  { %v2176_v33 = vadd.f32 %v2165_v4, %v2156_v0 }
 0x394   :  { %vm2180_vm0 = vcmp.ge.f32.partialorder %v2176_v33, 0.0  ;;  %v2184_v50 = vmul.f32 0.2, %v2176_v33 }
 0x396   :  { %v2188_v58 = vsel %vm2180_vm0, %v2176_v33, %v2184_v50 }
 0x397   :  { %v2193_v54 = vsel %vm2192_vm1, %v2188_v58, -inf }
 0x398   :  { %2194 = vmax.xlane.f32.xlu1 %v2193_v54 }
 0x3a7   :  { %v2151_v55 = vpop.permute.xlu2 %2150 }
 0x3a8   :  { %v2159_v40 = vadd.f32 %v2151_v55, %v4081_v35 }
 0x3af   :  { %v2147_v45 = vpop.permute.xlu0 %2146  ;;  %v2169_v56 = vpop.permute.xlu2 %2168 }
 0x3b0   :  { %v2157_v36 = vadd.f32 %v2147_v45, %v4077_v26  ;;  %v3464_v45 = vld [vmem:[%s4444_s3 + $0x10] sm:$0xff] }
 0x3b7   :  { %v2149_v41 = vpop.permute.xlu1 %2148  ;;  %v2171_v38 = vpop.permute.xlu0 %2170 }
 0x3b8   :  { %v2158_v13 = vadd.f32 %v2149_v41, %v4079_v31  ;;  %v2179_v11 = vadd.f32 %v2171_v38, %v2159_v40  ;;  %v3465_v41 = vld [vmem:[%s4444_s3 + $0x18] sm:$0xff] }
 0x3ba   :  { %v2178_v57 = vadd.f32 %v2169_v56, %v2158_v13  ;;  %v2187_v18 = vmul.f32 0.2, %v2179_v11  ;;  %vm2183_vm5 = vcmp.ge.f32.partialorder %v2179_v11, 0.0  ;;  %v4159_v13 = vld [vmem:[%s4444_s3 + $0x28] sm:$0xff] }
 0x3bb   :  { %v4162_v56 = vperm.slane %v4159_v13, 0 }
 0x3bc   :  { %vm2182_vm3 = vcmp.ge.f32.partialorder %v2178_v57, 0.0  ;;  %v2186_v27 = vmul.f32 0.2, %v2178_v57  ;;  %v2191_v21 = vsel %vm2183_vm5, %v2179_v11, %v2187_v18 }
 0x3bd   :  { %v2202_v39 = vsel %vm2192_vm1, %v2191_v21, -inf }
 0x3be   :  { %v2190_v24 = vsel %vm2182_vm3, %v2178_v57, %v2186_v27 }
 0x3bf   :  { %v2167_v37 = vpop.permute.xlu1 %2166  ;;  %v2199_v29 = vsel %vm2192_vm1, %v2190_v24, -inf }
 0x3c0   :  { %v2177_v15 = vadd.f32 %v2167_v37, %v2157_v36  ;;  %2200 = vmax.xlane.f32.xlu0 %v2199_v29 }
 0x3c2   :  { %v2185_v1 = vmul.f32 0.2, %v2177_v15  ;;  %vm2181_vm4 = vcmp.ge.f32.partialorder %v2177_v15, 0.0 }
 0x3c4   :  { %v2189_v22 = vsel %vm2181_vm4, %v2177_v15, %v2185_v1 }
 0x3c5   :  { %v2196_v23 = vsel %vm2192_vm1, %v2189_v22, -inf }
 0x3c6   :  { %2197 = vmax.xlane.f32.xlu2 %v2196_v23 }
 0x3ce   :  { %2203 = vmax.xlane.f32.xlu2 %v2202_v39 }
 0x3d4   :  { %2227 = vperm.xlu0 %3429, %v3462_v61  }
 0x40b   :  { %v2195_v28 = vpop.xlane.xlu1 %2194 }
 0x433   :  { %v2201_v63 = vpop.xlane.xlu0 %2200 }
 0x439   :  { %v2198_v44 = vpop.xlane.xlu2 %2197 }
 0x43a   :  { %v2205_v9 = vmax.f32 %v2195_v28, %v2198_v44 }
 0x441   :  { %v2204_v47 = vpop.xlane.xlu2 %2203 }
 0x442   :  { %v2206_v19 = vmax.f32 %v2201_v63, %v2204_v47 }
 0x444   :  { %v2207_v2 = vmax.f32 %v2205_v9, %v2206_v19 }
 0x446   :  { %v2208_v14 = vrot.slane %v2207_v2, 4  ;;  %v2228_v57 = vpop.permute.xlu0 %2227 }
 0x447   :  { %vm2239_vm7 = vcmp.eq.s32.totalorder %v2228_v57, %v4162_v56 }
 0x448   :  { %v2209_v49 = vmax.f32 %v2207_v2, %v2208_v14  ;;  %v4166_v36 = vsel %vm2239_vm7, 1.0, %v3494_v34 }
 0x449   :  { %v2281_v38 = vsel %vm509_vm2, %v4166_v36, 0 }
 0x44a   :  { %v2210_v60 = vrot.slane %v2209_v49, 2  ;;  %v2325_v15 = vsub.f32 %v2281_v38, %v2281_v38 }
 0x44c   :  { %v2211_v42 = vmax.f32 %v2209_v49, %v2210_v60  ;;  %v2326_v18 = vand.u32 4294901760, %v2325_v15 }
 0x44e   :  { %v2212_v5 = vrot.slane %v2211_v42, 1  ;;  %v2327_v61 = vsub.f32 %v2325_v15, %v2326_v18 }
 0x450   :  { %v2213_v51 = vmax.f32 %v2211_v42, %v2212_v5  ;;  %v2328_v49 = vand.u32 4294901760, %v2327_v61 }
 0x452   :  { %v2217_v7 = vsub.f32 %v2191_v21, %v2213_v51  ;;  %v2216_v10 = vsub.f32 %v2190_v24, %v2213_v51  ;;  %v2215_v32 = vsub.f32 %v2189_v22, %v2213_v51  ;;  %v2214_v53 = vsub.f32 %v2188_v58, %v2213_v51  ;;  %v3463_v58 = vld [vmem:[%s4444_s3 + $0x8] sm:$0xff] }
 0x454   :  { %v2224_v16 = vmul.f32 1.442695, %v2217_v7  ;;  %v2222_v20 = vmul.f32 1.442695, %v2216_v10  ;;  %v2220_v0 = vmul.f32 1.442695, %v2215_v32 }
 0x455   :  { %v2218_v4 = vmul.f32 1.442695, %v2214_v53 }
 0x456   :  { %3432 = vpow2.f32 %v2224_v16 }
 0x457   :  { %3434 = vpow2.f32 %v2222_v20 }
 0x458   :  { %3436 = vpow2.f32 %v2220_v0 }
 0x459   :  { %3438 = vpow2.f32 %v2218_v4  ;;  %v4195_v4 = vld [vmem:[%s4444_s3 + $0x20] sm:$0xff] }
 0x45c   :  { %v4131_v33 = vpop.eup %3432 }
 0x45d   :  { %v4133_v50 = vpop.eup %3434  ;;  %2274 = vrot.lane.b32.xlu1 %v4131_v33, %s3499_s17 }
 0x45e   :  { %2272 = vrot.lane.b32.xlu2 %v4133_v50, %s3499_s17  ;;  %v4139_v54 = vpop.eup %3436 }
 0x45f   :  { %v4141_v55 = vpop.eup %3438 }
 0x465   :  { %2270 = vrot.lane.b32.xlu1 %v4139_v54, %s3499_s17 }
 0x466   :  { %2268 = vrot.lane.b32.xlu2 %v4141_v55, %s3499_s17 }
 0x46d   :  { %2230 = vperm.xlu1 %3430, %v3463_v58  }
 0x46e   :  { %2233 = vperm.xlu2 %3431, %v3464_v45  }
 0x475   :  { %2236 = vperm.xlu1 %3430, %v3465_v41  }
 0x4b8   :  { %v2273_v27 = vpop.permute.xlu2 %2272 }
 0x4b9   :  { %v4168_v24 = vand.u32 4294901760, %v2273_v27 }
 0x4bb   :  { %v2408_v37 = vsub.f32 %v2273_v27, %v4168_v24  ;;  %v2251_v27 = vperm.slane %v4195_v4, 0 }
 0x4bd   :  { %v2409_v1 = vand.u32 4294901760, %v2408_v37  ;;  %vm2252_vm11 = vcmp.eq.s32.totalorder %v3928_v59, %v2251_v27  ;;  %vm2253_vm12 = vcmp.eq.s32.totalorder %v3934_v6, %v2251_v27  ;;  %vm2254_vm13 = vcmp.eq.s32.totalorder %v3980_v30, %v2251_v27 }
 0x4be   :  { %vm2255_vm14 = vcmp.eq.s32.totalorder %v3973_v43, %v2251_v27 }
 0x4bf   :  { %v2410_v48 = vsub.f32 %v2408_v37, %v2409_v1 }
 0x4c0   :  { %v2269_v29 = vpop.permute.xlu2 %2268 }
 0x4c1   :  { %v4173_v22 = vand.u32 4294901760, %v2269_v29  ;;  %v2411_v2 = vand.u32 4294901760, %v2410_v48 }
 0x4c3   :  { %v2420_v39 = vsub.f32 %v2269_v29, %v4173_v22 }
 0x4c5   :  { %v2421_v14 = vand.u32 4294901760, %v2420_v39 }
 0x4c7   :  { %v2422_v5 = vsub.f32 %v2420_v39, %v2421_v14 }
 0x4c8   :  { %v2234_v9 = vpop.permute.xlu2 %2233 }
 0x4c9   :  { %vm2241_vm8 = vcmp.eq.s32.totalorder %v2234_v9, %v4162_v56  ;;  %v2423_v20 = vand.u32 4294901760, %v2422_v5 }
 0x4ca   :  { %v4182_v7 = vsel %vm2241_vm8, 1.0, %v3494_v34 }
 0x4cb   :  { %v2287_v53 = vsel %vm509_vm2, %v4182_v7, 0 }
 0x4cc   :  { %v2341_v45 = vsub.f32 %v2287_v53, %v2287_v53 }
 0x4ce   :  { %v2342_v29 = vand.u32 4294901760, %v2341_v45 }
 0x4cf   :  { %v2275_v40 = vpop.permute.xlu1 %2274 }
 0x4d0   :  { %v2316_v11 = vand.u32 4294901760, %v2275_v40 }
 0x4d2   :  { %v2402_v23 = vsub.f32 %v2275_v40, %v2316_v11  ;;  %2317 = vmatpush.msra.mxu0 %v2316_v11  ;;  %2536 = vmatpush.msrb.mxu3 %v2316_v11 }
 0x4d4   :  { %v2403_v21 = vand.u32 4294901760, %v2402_v23  ;;  %2319 = vmatpush.msra.mxu0 %v4168_v24  ;;  %2472 = vmatpush.msrb.mxu2 %v2402_v23 }
 0x4d5   :  { %2538 = vmatpush.msrb.mxu3 %v4168_v24 }
 0x4d6   :  { %v2404_v44 = vsub.f32 %v2402_v23, %v2403_v21  ;;  %2475 = vmatpush.msrb.mxu2 %v2408_v37 }
 0x4d7   :  { %v2271_v28 = vpop.permute.xlu1 %2270 }
 0x4d8   :  { %v2405_v63 = vand.u32 4294901760, %v2404_v44  ;;  %v2320_v47 = vand.u32 4294901760, %v2271_v28 }
 0x4da   :  { %v2414_v19 = vsub.f32 %v2271_v28, %v2320_v47  ;;  %2321 = vmatpush.msra.mxu0 %v2320_v47  ;;  %2406 = vmatpush.msra.mxu1 %v2405_v63  ;;  %v3352_v28 = vsel %vm2254_vm13, 1.0, %v3494_v34 }
 0x4db   :  { %2540 = vmatpush.msrb.mxu3 %v2320_v47 }
 0x4dc   :  { %2323 = vmatpush.msra.mxu0 %v4173_v22  ;;  %2412 = vmatpush.msra.mxu1 %v2411_v2  ;;  %v2415_v60 = vand.u32 4294901760, %v2414_v19 }
 0x4dd   :  { %2478 = vmatpush.msrb.mxu2 %v2414_v19  ;;  %2542 = vmatpush.msrb.mxu3 %v4173_v22 }
 0x4de   :  { %2607 = vmatpush.msrb.mxu0 %v2403_v21  ;;  %2546 = vmatmul.f32.vlgmr.msrb.gmra.mxu3 %v2326_v18  ;;  %v2416_v42 = vsub.f32 %v2414_v19, %v2415_v60  ;;  %v3351_v18 = vsel %vm2253_vm12, 1.0, %v3494_v34  ;;  %v3353_v19 = vsel %vm2255_vm14, 1.0, %v3494_v34 }
 0x4df   :  { %2481 = vmatpush.msrb.mxu2 %v2420_v39  ;;  %v2231_v51 = vpop.permute.xlu1 %2230  ;;  %2329 = vmatmul.f32.vlgmr.msra.gmra.mxu0 %v2328_v49  ;;  %v2296_v44 = vsel %vm509_vm2, %v3351_v18, 0  ;;  %v2302_v49 = vsel %vm509_vm2, %v3353_v19, 0 }
 0x4e0   :  { %vm2240_vm9 = vcmp.eq.s32.totalorder %v2231_v51, %v4162_v56  ;;  %2484 = vmatmul.f32.vlgmr.msrb.gmra.mxu2 %v2325_v15  ;;  %2611 = vmatpush.msrb.mxu0 %v2409_v1  ;;  %v2417_v10 = vand.u32 4294901760, %v2416_v42  ;;  %v2365_v48 = vsub.f32 %v2296_v44, %v2296_v44  ;;  %v2381_v42 = vsub.f32 %v2302_v49, %v2302_v49 }
 0x4e1   :  { %v4186_v16 = vsel %vm2240_vm9, 1.0, %v3494_v34 }
 0x4e2   :  { %2615 = vmatpush.msrb.mxu0 %v2415_v60  ;;  %2418 = vmatpush.msra.mxu1 %v2417_v10  ;;  %v2284_v32 = vsel %vm509_vm2, %v4186_v16, 0  ;;  %v2366_v63 = vand.u32 4294901760, %v2365_v48  ;;  %v2382_v5 = vand.u32 4294901760, %v2381_v42 }
 0x4e3   :  { %v2333_v0 = vsub.f32 %v2284_v32, %v2284_v32 }
 0x4e4   :  { %2619 = vmatpush.msrb.mxu0 %v2421_v14  ;;  %2424 = vmatpush.msra.mxu1 %v2423_v20  ;;  %v2367_v30 = vsub.f32 %v2365_v48, %v2366_v63  ;;  %v2383_v51 = vsub.f32 %v2381_v42, %v2382_v5 }
 0x4e5   :  { %3354 = vmatmul.msk.f32.vlgmr.msra.gmra.mxu1 %vm509_vm2, %v4166_v36  ;;  %v2334_v58 = vand.u32 4294901760, %v2333_v0 }
 0x4e6   :  { %2666 = vmatpush.msrb.mxu1 %v2316_v11  ;;  %v2368_v2 = vand.u32 4294901760, %v2367_v30  ;;  %v2384_v10 = vand.u32 4294901760, %v2383_v51 }
 0x4e7   :  { %2552 = vmatmul.f32.gmra.mxu3 %v2334_v58  ;;  %v2335_v41 = vsub.f32 %v2333_v0, %v2334_v58  ;;  %v2237_v57 = vpop.permute.xlu1 %2236 }
 0x4e8   :  { %2668 = vmatpush.msrb.mxu1 %v4168_v24  ;;  %2489 = vmatmul.f32.gmra.mxu2 %v2333_v0  ;;  %vm2242_vm10 = vcmp.eq.s32.totalorder %v2237_v57, %v4162_v56  ;;  %v2343_v24 = vsub.f32 %v2341_v45, %v2342_v29  ;;  %v4212_v56 = vsel %vm2252_vm11, 1.0, %v3494_v34 }
 0x4e9   :  { %v2336_v38 = vand.u32 4294901760, %v2335_v41  ;;  %v4203_v37 = vsel %vm2242_vm10, 1.0, %v3494_v34  ;;  %v2293_v23 = vsel %vm509_vm2, %v4212_v56, 0 }
 0x4ea   :  { %2670 = vmatpush.msrb.mxu1 %v2320_v47  ;;  %v2290_v40 = vsel %vm509_vm2, %v4203_v37, 0  ;;  %v2344_v11 = vand.u32 4294901760, %v2343_v24  ;;  %v2299_v47 = vsel %vm509_vm2, %v3352_v28, 0 }
 0x4eb   :  { %2337 = vmatmul.f32.gmra.mxu0 %v2336_v38  ;;  %v2349_v15 = vsub.f32 %v2290_v40, %v2290_v40  ;;  %v2373_v9 = vsub.f32 %v2299_v47, %v2299_v47 }
 0x4ec   :  { %2672 = vmatpush.msrb.mxu1 %v4173_v22  ;;  %v2357_v22 = vsub.f32 %v2293_v23, %v2293_v23 }
 0x4ed   :  { %3355 = vmatmul.msk.f32.gmra.mxu1 %vm509_vm2, %v4186_v16  ;;  %v2350_v1 = vand.u32 4294901760, %v2349_v15  ;;  %v2374_v14 = vand.u32 4294901760, %v2373_v9 }
 0x4ee   :  { %v2358_v39 = vand.u32 4294901760, %v2357_v22 }
 0x4ef   :  { %2558 = vmatmul.f32.gmra.mxu3 %v2342_v29  ;;  %v2351_v59 = vsub.f32 %v2349_v15, %v2350_v1  ;;  %v2375_v60 = vsub.f32 %v2373_v9, %v2374_v14 }
 0x4f0   :  { %2494 = vmatmul.f32.gmra.mxu2 %v2341_v45  ;;  %v2359_v6 = vsub.f32 %v2357_v22, %v2358_v39 }
 0x4f1   :  { %v2352_v21 = vand.u32 4294901760, %v2351_v59  ;;  %v2376_v43 = vand.u32 4294901760, %v2375_v60 }
 0x4f2   :  { %v2360_v61 = vand.u32 4294901760, %v2359_v6 }
 0x4f3   :  { %2345 = vmatmul.f32.gmra.mxu0 %v2344_v11 }
 0x4f5   :  { %3356 = vmatmul.msk.f32.gmra.mxu1 %vm509_vm2, %v4182_v7 }
 0x4f7   :  { %2564 = vmatmul.f32.gmra.mxu3 %v2350_v1 }
 0x4f8   :  { %2499 = vmatmul.f32.gmra.mxu2 %v2349_v15 }
 0x4fb   :  { %2353 = vmatmul.f32.gmra.mxu0 %v2352_v21 }
 0x4fd   :  { %3357 = vmatmul.msk.f32.gmra.mxu1 %vm509_vm2, %v4203_v37 }
 0x4ff   :  { %2570 = vmatmul.f32.gmra.mxu3 %v2358_v39 }
 0x500   :  { %2504 = vmatmul.f32.gmra.mxu2 %v2357_v22 }
 0x503   :  { %2361 = vmatmul.f32.gmra.mxu0 %v2360_v61 }
 0x505   :  { %3358 = vmatmul.msk.f32.gmra.mxu1 %vm509_vm2, %v4212_v56 }
 0x507   :  { %2576 = vmatmul.f32.gmra.mxu3 %v2366_v63 }
 0x508   :  { %2509 = vmatmul.f32.gmra.mxu2 %v2365_v48 }
 0x50b   :  { %2369 = vmatmul.f32.gmra.mxu0 %v2368_v2 }
 0x50d   :  { %3359 = vmatmul.msk.f32.gmra.mxu1 %vm509_vm2, %v3351_v18 }
 0x50f   :  { %2582 = vmatmul.f32.gmra.mxu3 %v2374_v14 }
 0x510   :  { %2514 = vmatmul.f32.gmra.mxu2 %v2373_v9 }
 0x513   :  { %2377 = vmatmul.f32.gmra.mxu0 %v2376_v43 }
 0x515   :  { %3360 = vmatmul.msk.f32.gmra.mxu1 %vm509_vm2, %v3352_v28 }
 0x517   :  { %2588 = vmatmul.f32.gmra.mxu3 %v2382_v5 }
 0x518   :  { %2519 = vmatmul.f32.gmra.mxu2 %v2381_v42 }
 0x51b   :  { %2385 = vmatmul.f32.gmra.mxu0 %v2384_v10 }
 0x51d   :  { %3361 = vmatmul.msk.f32.gmra.mxu1 %vm509_vm2, %v3353_v19 }
 0x523   :  { %3362 = vmatmul.msk.f32.vlgmr.msrb.gmra.mxu0 %vm509_vm2, %v4166_v36 }
 0x525   :  { %3370 = vmatmul.msk.f32.vlgmr.msrb.gmra.mxu1 %vm509_vm2, %v4166_v36 }
 0x52b   :  { %3363 = vmatmul.msk.f32.gmra.mxu0 %vm509_vm2, %v4186_v16 }
 0x52d   :  { %3371 = vmatmul.msk.f32.gmra.mxu1 %vm509_vm2, %v4186_v16 }
 0x533   :  { %3364 = vmatmul.msk.f32.gmra.mxu0 %vm509_vm2, %v4182_v7 }
 0x535   :  { %3372 = vmatmul.msk.f32.gmra.mxu1 %vm509_vm2, %v4182_v7 }
 0x53b   :  { %3365 = vmatmul.msk.f32.gmra.mxu0 %vm509_vm2, %v4203_v37 }
 0x53d   :  { %3373 = vmatmul.msk.f32.gmra.mxu1 %vm509_vm2, %v4203_v37 }
 0x543   :  { %3366 = vmatmul.msk.f32.gmra.mxu0 %vm509_vm2, %v4212_v56 }
 0x545   :  { %3374 = vmatmul.msk.f32.gmra.mxu1 %vm509_vm2, %v4212_v56 }
 0x54b   :  { %3367 = vmatmul.msk.f32.gmra.mxu0 %vm509_vm2, %v3351_v18 }
 0x54d   :  { %3375 = vmatmul.msk.f32.gmra.mxu1 %vm509_vm2, %v3351_v18 }
 0x553   :  { %3368 = vmatmul.msk.f32.gmra.mxu0 %vm509_vm2, %v3352_v28 }
 0x555   :  { %3376 = vmatmul.msk.f32.gmra.mxu1 %vm509_vm2, %v3352_v28 }
 0x55b   :  { %3369 = vmatmul.msk.f32.gmra.mxu0 %vm509_vm2, %v3353_v19 }
 0x55c   :  { %v2330_v36 = vpop.f32.mrf.mxu0 }
 0x55d   :  { %3377 = vmatmul.msk.f32.gmra.mxu1 %vm509_vm2, %v3353_v19 }
 0x561   :  { %v2547_v40 = vpop.f32.mrf.mxu3 }
 0x562   :  { %v2427_v7 = vpop.f32.mrf.mxu1 }
 0x563   :  { %v2428_v16 = vadd.f32 %v2427_v7, %v2330_v36  ;;  %v2485_v29 = vpop.f32.mrf.mxu2 }
 0x565   :  { %v2486_v7 = vadd.f32 %v2485_v29, %v2428_v16 }
 0x568   :  { %v2338_v20 = vpop.f32.mrf.mxu0 }
 0x56a   :  { %v2431_v32 = vpop.f32.mrf.mxu1  ;;  %v2553_v1 = vpop.f32.mrf.mxu3 }
 0x56b   :  { %v2490_v56 = vpop.f32.mrf.mxu2  ;;  %v2432_v59 = vadd.f32 %v2431_v32, %v2338_v20 }
 0x56d   :  { %v2491_v39 = vadd.f32 %v2490_v56, %v2432_v59 }
 0x56f   :  { %v2554_v6 = vadd.f32 %v2553_v1, %v2491_v39 }
 0x570   :  { %v2346_v53 = vpop.f32.mrf.mxu0 }
 0x572   :  { %v2435_v0 = vpop.f32.mrf.mxu1  ;;  %v2559_v44 = vpop.f32.mrf.mxu3 }
 0x573   :  { %v2495_v22 = vpop.f32.mrf.mxu2  ;;  %v2436_v48 = vadd.f32 %v2435_v0, %v2346_v53 }
 0x575   :  { %v2496_v30 = vadd.f32 %v2495_v22, %v2436_v48 }
 0x577   :  { %v2560_v14 = vadd.f32 %v2559_v44, %v2496_v30 }
 0x578   :  { %v2354_v58 = vpop.f32.mrf.mxu0 }
 0x57a   :  { %v2439_v45 = vpop.f32.mrf.mxu1  ;;  %v2565_v2 = vpop.f32.mrf.mxu3 }
 0x57b   :  { %v2500_v63 = vpop.f32.mrf.mxu2  ;;  %v2440_v49 = vadd.f32 %v2439_v45, %v2354_v58 }
 0x57d   :  { %v2501_v5 = vadd.f32 %v2500_v63, %v2440_v49 }
 0x57f   :  { %v2566_v20 = vadd.f32 %v2565_v2, %v2501_v5 }
 0x580   :  { %v2362_v41 = vpop.f32.mrf.mxu0 }
 0x582   :  { %v2443_v57 = vpop.f32.mrf.mxu1  ;;  %v2571_v32 = vpop.f32.mrf.mxu3 }
 0x583   :  { %v4260_v27 = vadd.f32 %v2443_v57, %v2362_v41  ;;  %v2505_v10 = vpop.f32.mrf.mxu2  ;;  %v2548_v57 = vadd.f32 %v2547_v40, %v2486_v7 }
 0x588   :  { %v2370_v38 = vpop.f32.mrf.mxu0 }
 0x58a   :  { %v2447_v37 = vpop.f32.mrf.mxu1  ;;  %v2577_v44 = vpop.f32.mrf.mxu3 }
 0x58b   :  { %v2510_v1 = vpop.f32.mrf.mxu2  ;;  %v2448_v59 = vadd.f32 %v2447_v37, %v2370_v38 }
 0x58d   :  { %v2511_v16 = vadd.f32 %v2510_v1, %v2448_v59 }
 0x58f   :  { %v2578_v48 = vadd.f32 %v2577_v44, %v2511_v16 }
 0x590   :  { %v2378_v24 = vpop.f32.mrf.mxu0 }
 0x592   :  { %v2451_v15 = vpop.f32.mrf.mxu1 }
 0x598   :  { %v2386_v11 = vpop.f32.mrf.mxu0 }
 0x59a   :  { %v2455_v23 = vpop.f32.mrf.mxu1 }
 0x5a0   :  { %v2622_v18 = vpop.f32.mrf.mxu0 }
 0x5a1   :  { %v2623_v58 = vadd.f32 %v2622_v18, %v2548_v57 }
 0x5a2   :  { %v2675_v21 = vpop.f32.mrf.mxu1 }
 0x5a3   :  { %v2676_v39 = vadd.f32 %v2675_v21, %v2623_v58 }
 0x5a5   :  { %v2706_v29 = vadd.f32 1e-16, %v2676_v39 }
 0x5a8   :  { %v2626_v28 = vpop.f32.mrf.mxu0 }
 0x5a9   :  { %v2627_v61 = vadd.f32 %v2626_v28, %v2554_v6  ;;  %v2452_v28 = vadd.f32 %v2451_v15, %v2378_v24 }
 0x5aa   :  { %v2679_v47 = vpop.f32.mrf.mxu1 }
 0x5ab   :  { %v2680_v9 = vadd.f32 %v2679_v47, %v2627_v61  ;;  %v2515_v61 = vpop.f32.mrf.mxu2 }
 0x5ac   :  { %v2516_v18 = vadd.f32 %v2515_v61, %v2452_v28 }
 0x5ad   :  { %v2707_v19 = vadd.f32 1e-16, %v2680_v9  ;;  %v2583_v9 = vpop.f32.mrf.mxu3 }
 0x5ae   :  { %v2584_v37 = vadd.f32 %v2583_v9, %v2516_v18 }
 0x5af   :  { %2716 = vrot.lane.b32.xlu1 %v2707_v19, %s3495_s4  ;;  %v2456_v19 = vadd.f32 %v2455_v23, %v2386_v11 }
 0x5b0   :  { %v2630_v60 = vpop.f32.mrf.mxu0 }
 0x5b1   :  { %v2631_v42 = vadd.f32 %v2630_v60, %v2560_v14 }
 0x5b2   :  { %v2683_v43 = vpop.f32.mrf.mxu1 }
 0x5b3   :  { %v2684_v51 = vadd.f32 %v2683_v43, %v2631_v42  ;;  %v2520_v14 = vpop.f32.mrf.mxu2  ;;  %v2506_v43 = vadd.f32 %v2505_v10, %v4260_v27 }
 0x5b4   :  { %v2521_v60 = vadd.f32 %v2520_v14, %v2456_v19 }
 0x5b5   :  { %v2708_v36 = vadd.f32 1e-16, %v2684_v51  ;;  %v2589_v42 = vpop.f32.mrf.mxu3 }
 0x5b6   :  { %v2590_v5 = vadd.f32 %v2589_v42, %v2521_v60 }
 0x5b7   :  { %2718 = vrot.lane.b32.xlu0 %v2708_v36, %s3495_s4 }
 0x5b8   :  { %v2634_v53 = vpop.f32.mrf.mxu0 }
 0x5b9   :  { %v2635_v0 = vadd.f32 %v2634_v53, %v2566_v20  ;;  %v2572_v20 = vadd.f32 %v2571_v32, %v2506_v43 }
 0x5ba   :  { %v2687_v41 = vpop.f32.mrf.mxu1 }
 0x5bb   :  { %v2688_v56 = vadd.f32 %v2687_v41, %v2635_v0 }
 0x5bd   :  { %v2709_v45 = vadd.f32 1e-16, %v2688_v56 }
 0x5bf   :  { %2720 = vrot.lane.b32.xlu2 %v2709_v45, %s3495_s4 }
 0x5c0   :  { %v2638_v22 = vpop.f32.mrf.mxu0 }
 0x5c1   :  { %v2639_v23 = vadd.f32 %v2638_v22, %v2572_v20 }
 0x5c2   :  { %v2691_v6 = vpop.f32.mrf.mxu1 }
 0x5c3   :  { %v2692_v0 = vadd.f32 %v2691_v6, %v2639_v23 }
 0x5c5   :  { %v2786_v41 = vadd.f32 1e-16, %v2692_v0 }
 0x5c7   :  { %2714 = vrot.lane.b32.xlu2 %v2706_v29, %s3495_s4 }
 0x5c8   :  { %v2642_v63 = vpop.f32.mrf.mxu0 }
 0x5c9   :  { %v2643_v40 = vadd.f32 %v2642_v63, %v2578_v48 }
 0x5ca   :  { %v2695_v47 = vpop.f32.mrf.mxu1 }
 0x5cb   :  { %v2696_v30 = vadd.f32 %v2695_v47, %v2643_v40 }
 0x5cd   :  { %v2787_v38 = vadd.f32 1e-16, %v2696_v30 }
 0x5cf   :  { %2796 = vrot.lane.b32.xlu2 %v2787_v38, %s3495_s4 }
 0x5d0   :  { %v2646_v21 = vpop.f32.mrf.mxu0 }
 0x5d1   :  { %v2647_v2 = vadd.f32 %v2646_v21, %v2584_v37 }
 0x5d2   :  { %v2699_v49 = vpop.f32.mrf.mxu1 }
 0x5d3   :  { %v2700_v24 = vadd.f32 %v2699_v49, %v2647_v2 }
 0x5d5   :  { %v2788_v15 = vadd.f32 1e-16, %v2700_v24 }
 0x5d7   :  { %2798 = vrot.lane.b32.xlu1 %v2788_v15, %s3495_s4 }
 0x5d8   :  { %v2650_v51 = vpop.f32.mrf.mxu0 }
 0x5d9   :  { %v2651_v36 = vadd.f32 %v2650_v51, %v2590_v5 }
 0x5da   :  { %v2703_v7 = vpop.f32.mrf.mxu1 }
 0x5db   :  { %v2704_v11 = vadd.f32 %v2703_v7, %v2651_v36 }
 0x5dd   :  { %v2789_v53 = vadd.f32 1e-16, %v2704_v11 }
 0x5df   :  { %2800 = vrot.lane.b32.xlu0 %v2789_v53, %s3495_s4 }
 0x5e7   :  { %2794 = vrot.lane.b32.xlu0 %v2786_v41, %s3495_s4 }
 0x619   :  { %v2721_v57 = vpop.permute.xlu2 %2720 }
 0x61a   :  { %3440 = vrcp.f32 %v2721_v57  ;;  %v2782_v32 = vand.u32 2147483648, %v2721_v57  ;;  %vm2776_vm0 = vweird.f32 %v2721_v57  ;;  %v2780_v22 = vand.u32 2147483647, %v2721_v57 }
 0x61c   :  { %v2783_v48 = vor.u32 1.1754944e-38, %v2782_v32  ;;  %vm2781_vm3 = vcmp.eq.f32.partialorder %v2780_v22, 8.507059e+37 }
 0x620   :  { %v3441_v56 = vpop.eup %3440 }
 0x621   :  { %v2772_v27 = vmul.f32 %v3441_v56, %v2721_v57  ;;  %v2717_v10 = vpop.permute.xlu1 %2716  ;;  %v2715_v58 = vpop.permute.xlu2 %2714  ;;  %vm2777_vm15 = vweird.f32 %v3441_v56 }
 0x622   :  { %3442 = vrcp.f32 %v2717_v10  ;;  %vm2778_vm1 = vmor %vm2776_vm0, %vm2777_vm15  ;;  %v2752_v63 = vand.u32 2147483648, %v2717_v10  ;;  %v2737_v47 = vand.u32 2147483648, %v2715_v58  ;;  %v2750_v38 = vand.u32 2147483647, %v2717_v10 }
 0x623   :  { %v2773_v45 = vsub.f32 1.0, %v2772_v27  ;;  %3444 = vrcp.f32 %v2715_v58  ;;  %v2735_v19 = vand.u32 2147483647, %v2715_v58  ;;  %vm2746_vm7 = vweird.f32 %v2717_v10 }
 0x624   :  { %v2753_v14 = vor.u32 1.1754944e-38, %v2752_v63  ;;  %vm2731_vm8 = vweird.f32 %v2715_v58  ;;  %v2738_v60 = vor.u32 1.1754944e-38, %v2737_v47  ;;  %vm2751_vm11 = vcmp.eq.f32.partialorder %v2750_v38, 8.507059e+37 }
 0x625   :  { %v2774_v1 = vmul.f32 %v3441_v56, %v2773_v45  ;;  %vm2736_vm12 = vcmp.eq.f32.partialorder %v2735_v19, 8.507059e+37 }
 0x627   :  { %v2775_v59 = vadd.f32 %v3441_v56, %v2774_v1 }
 0x628   :  { %v3443_v39 = vpop.eup %3442 }
 0x629   :  { %v3445_v44 = vpop.eup %3444  ;;  %v2742_v6 = vmul.f32 %v3443_v39, %v2717_v10  ;;  %v2719_v16 = vpop.permute.xlu0 %2718  ;;  %v2779_v29 = vsel %vm2778_vm1, %v3441_v56, %v2775_v59  ;;  %vm2747_vm4 = vweird.f32 %v3443_v39 }
 0x62a   :  { %v2727_v28 = vmul.f32 %v3445_v44, %v2715_v58  ;;  %3446 = vrcp.f32 %v2719_v16  ;;  %v2784_v18 = vsel %vm2781_vm3, %v2783_v48, %v2779_v29  ;;  %vm2732_vm5 = vweird.f32 %v3445_v44  ;;  %vm2748_vm9 = vmor %vm2746_vm7, %vm2747_vm4  ;;  %v4279_v58 = vpop.permute.xlu2 %2796 }
 0x62b   :  { %v2743_v61 = vsub.f32 1.0, %v2742_v6  ;;  %v2785_v9 = vmul.f32 %v4131_v33, %v2784_v18  ;;  %vm2733_vm10 = vmor %vm2731_vm8, %vm2732_vm5  ;;  %v2767_v7 = vand.u32 2147483648, %v2719_v16  ;;  %v2765_v23 = vand.u32 2147483647, %v2719_v16 }
 0x62c   :  { %v2728_v40 = vsub.f32 1.0, %v2727_v28  ;;  %vm2761_vm14 = vweird.f32 %v2719_v16 }
 0x62d   :  { %v2744_v30 = vmul.f32 %v3443_v39, %v2743_v61  ;;  %2900 = vrot.lane.b32.xlu1 %v2785_v9, %s3499_s17  ;;  %v2768_v0 = vor.u32 1.1754944e-38, %v2767_v7  ;;  %vm2766_vm0 = vcmp.eq.f32.partialorder %v2765_v23, 8.507059e+37 }
 0x62e   :  { %v2729_v37 = vmul.f32 %v3445_v44, %v2728_v40 }
 0x62f   :  { %v2745_v21 = vadd.f32 %v3443_v39, %v2744_v30 }
 0x630   :  { %v3447_v2 = vpop.eup %3446  ;;  %v2730_v49 = vadd.f32 %v3445_v44, %v2729_v37 }
 0x631   :  { %v2757_v24 = vmul.f32 %v3447_v2, %v2719_v16  ;;  %v2749_v15 = vsel %vm2748_vm9, %v3443_v39, %v2745_v21  ;;  %vm2762_vm13 = vweird.f32 %v3447_v2 }
 0x632   :  { %v2734_v42 = vsel %vm2733_vm10, %v3445_v44, %v2730_v49  ;;  %v2754_v43 = vsel %vm2751_vm11, %v2753_v14, %v2749_v15  ;;  %vm2763_vm15 = vmor %vm2761_vm14, %vm2762_vm13  ;;  %vm2826_vm10 = vweird.f32 %v4279_v58 }
 0x633   :  { %v2758_v5 = vsub.f32 1.0, %v2757_v24  ;;  %v2739_v51 = vsel %vm2736_vm12, %v2738_v60, %v2734_v42  ;;  %v2755_v36 = vmul.f32 %v4139_v54, %v2754_v43  ;;  %v2832_v43 = vand.u32 2147483648, %v4279_v58 }
 0x634   :  { %v2740_v20 = vmul.f32 %v4141_v55, %v2739_v51  ;;  %v2830_v51 = vand.u32 2147483647, %v4279_v58 }
 0x635   :  { %v2759_v11 = vmul.f32 %v3447_v2, %v2758_v5  ;;  %2896 = vrot.lane.b32.xlu0 %v2755_v36, %s3499_s17 }
 0x636   :  { %2894 = vrot.lane.b32.xlu1 %v2740_v20, %s3499_s17  ;;  %vm2831_vm14 = vcmp.eq.f32.partialorder %v2830_v51, 8.507059e+37 }
 0x637   :  { %v2760_v53 = vadd.f32 %v3447_v2, %v2759_v11 }
 0x639   :  { %v2764_v41 = vsel %vm2763_vm15, %v3447_v2, %v2760_v53  ;;  %v2833_v53 = vor.u32 1.1754944e-38, %v2832_v43 }
 0x63a   :  { %v2769_v57 = vsel %vm2766_vm0, %v2768_v0, %v2764_v41 }
 0x63b   :  { %v2770_v56 = vmul.f32 %v4133_v50, %v2769_v57 }
 0x63d   :  { %2898 = vrot.lane.b32.xlu2 %v2770_v56, %s3499_s17 }
 0x649   :  { %v2799_v10 = vpop.permute.xlu1 %2798 }
 0x64a   :  { %v2847_v49 = vand.u32 2147483648, %v2799_v10  ;;  %vm2841_vm9 = vweird.f32 %v2799_v10 }
 0x651   :  { %v2801_v27 = vpop.permute.xlu0 %2800 }
 0x652   :  { %3448 = vrcp.f32 %v2801_v27  ;;  %vm2856_vm3 = vweird.f32 %v2801_v27  ;;  %v2862_v47 = vand.u32 2147483648, %v2801_v27  ;;  %v2860_v38 = vand.u32 2147483647, %v2801_v27 }
 0x653   :  { %3450 = vrcp.f32 %v2799_v10 }
 0x654   :  { %3452 = vrcp.f32 %v4279_v58  ;;  %v2863_v21 = vor.u32 1.1754944e-38, %v2862_v47  ;;  %vm2861_vm5 = vcmp.eq.f32.partialorder %v2860_v38, 8.507059e+37 }
 0x658   :  { %v3449_v45 = vpop.eup %3448 }
 0x659   :  { %v2852_v1 = vmul.f32 %v3449_v45, %v2801_v27  ;;  %v4282_v32 = vpop.permute.xlu0 %2794  ;;  %v3451_v59 = vpop.eup %3450  ;;  %vm2857_vm1 = vweird.f32 %v3449_v45 }
 0x65a   :  { %v3453_v6 = vpop.eup %3452  ;;  %3454 = vrcp.f32 %v4282_v32  ;;  %v2837_v16 = vmul.f32 %v3451_v59, %v2799_v10  ;;  %vm2858_vm4 = vmor %vm2856_vm3, %vm2857_vm1  ;;  %vm2842_vm7 = vweird.f32 %v3451_v59  ;;  %vm2811_vm0 = vweird.f32 %v4282_v32 }
 0x65b   :  { %v2853_v39 = vsub.f32 1.0, %v2852_v1  ;;  %v2822_v29 = vmul.f32 %v3453_v6, %v4279_v58  ;;  %vm2827_vm8 = vweird.f32 %v3453_v6  ;;  %vm2843_vm11 = vmor %vm2841_vm9, %vm2842_vm7  ;;  %v2815_v56 = vand.u32 2147483647, %v4282_v32 }
 0x65c   :  { %v2838_v28 = vsub.f32 1.0, %v2837_v16  ;;  %vm2828_vm12 = vmor %vm2826_vm10, %vm2827_vm8 }
 0x65d   :  { %v2854_v48 = vmul.f32 %v3449_v45, %v2853_v39  ;;  %v2823_v63 = vsub.f32 1.0, %v2822_v29  ;;  %vm2816_vm3 = vcmp.eq.f32.partialorder %v2815_v56, 8.507059e+37 }
 0x65e   :  { %v2839_v30 = vmul.f32 %v3451_v59, %v2838_v28 }
 0x65f   :  { %v2855_v40 = vadd.f32 %v3449_v45, %v2854_v48  ;;  %v2824_v37 = vmul.f32 %v3453_v6, %v2823_v63 }
 0x660   :  { %v4288_v61 = vpop.eup %3454  ;;  %v2840_v14 = vadd.f32 %v3451_v59, %v2839_v30 }
 0x661   :  { %v2859_v19 = vsel %vm2858_vm4, %v3449_v45, %v2855_v40  ;;  %v2825_v42 = vadd.f32 %v3453_v6, %v2824_v37  ;;  %vm2812_vm15 = vweird.f32 %v4288_v61 }
 0x662   :  { %v2864_v24 = vsel %vm2861_vm5, %v2863_v21, %v2859_v19  ;;  %v2844_v11 = vsel %vm2843_vm11, %v3451_v59, %v2840_v14  ;;  %vm2813_vm1 = vmor %vm2811_vm0, %vm2812_vm15 }
 0x663   :  { %v2865_v20 = vmul.f32 %v4131_v33, %v2864_v24  ;;  %v2829_v23 = vsel %vm2828_vm12, %v3453_v6, %v2825_v42  ;;  %v705_v42 = vshrl.u32 %v704_v25, 7 }
 0x664   :  { %v2834_v33 = vsel %vm2831_vm14, %v2833_v53, %v2829_v23 }
 0x665   :  { %v2835_v27 = vmul.f32 %v4139_v54, %v2834_v33 }
 0x697   :  { %v2899_v22 = vpop.permute.xlu2 %2898 }
 0x698   :  { %v2908_v44 = vmul.f32 %v2899_v22, %v4079_v31  ;;  %v2807_v31 = vmul.f32 %v4288_v61, %v4282_v32 }
 0x69a   :  { %2918 = vrot.lane.b32.xlu0 %v2908_v44, %s3495_s4  ;;  %v2808_v2 = vsub.f32 1.0, %v2807_v31 }
 0x69c   :  { %v2809_v36 = vmul.f32 %v4288_v61, %v2808_v2 }
 0x69e   :  { %v2810_v41 = vadd.f32 %v4288_v61, %v2809_v36 }
 0x69f   :  { %v2901_v18 = vpop.permute.xlu1 %2900 }
 0x6a0   :  { %v2909_v9 = vmul.f32 %v2901_v18, %v4081_v35  ;;  %v2845_v35 = vand.u32 2147483647, %v2799_v10  ;;  %v2814_v10 = vsel %vm2813_vm1, %v4288_v61, %v2810_v41 }
 0x6a2   :  { %2920 = vrot.lane.b32.xlu2 %v2909_v9, %s3495_s4  ;;  %vm2846_vm13 = vcmp.eq.f32.partialorder %v2845_v35, 8.507059e+37 }
 0x6a7   :  { %v2897_v60 = vpop.permute.xlu0 %2896 }
 0x6a8   :  { %v2907_v15 = vmul.f32 %v2897_v60, %v4077_v26  ;;  %v2895_v5 = vpop.permute.xlu1 %2894  ;;  %v2848_v26 = vor.u32 1.1754944e-38, %v2847_v49 }
 0x6a9   :  { %v2906_v7 = vmul.f32 %v2895_v5, %v4075_v8  ;;  %v2817_v8 = vand.u32 2147483648, %v4282_v32 }
 0x6aa   :  { %2916 = vrot.lane.b32.xlu1 %v2907_v15, %s3495_s4  ;;  %2876 = vrot.lane.b32.xlu2 %v2865_v20, %s3499_s17  ;;  %v2849_v0 = vsel %vm2846_vm13, %v2848_v26, %v2844_v11 }
 0x6ab   :  { %2914 = vrot.lane.b32.xlu0 %v2906_v7, %s3495_s4  ;;  %v2850_v57 = vmul.f32 %v4133_v50, %v2849_v0  ;;  %v2818_v58 = vor.u32 1.1754944e-38, %v2817_v8  ;;  %v706_v7 = vadd.s32 8, %v705_v42 }
 0x6ad   :  { %v2819_v45 = vsel %vm2816_vm3, %v2818_v58, %v2814_v10 }
 0x6ae   :  { %v2820_v1 = vmul.f32 %v4141_v55, %v2819_v45 }
 0x6b2   :  { %2874 = vrot.lane.b32.xlu1 %v2850_v57, %s3499_s17  ;;  %2872 = vrot.lane.b32.xlu2 %v2835_v27, %s3499_s17 }
 0x6b3   :  { %2930 = vrot.lane.b32.xlu0 %v4159_v13, %s3495_s4 }
 0x6ba   :  { %2870 = vrot.lane.b32.xlu1 %v2820_v1, %s3499_s17  ;;  %2940 = vrot.lane.b32.xlu2 %v3754_v3, %s3499_s17 }
 0x6bb   :  { %2942 = vrot.lane.b32.xlu0 %v3769_v12, %s3499_s17 }
 0x6fc   :  { %v2921_v50 = vpop.permute.xlu2 %2920 }
 0x6fd   :  { %v2929_v54 = vsel %vm509_vm2, 0.0, %v2921_v50 }
 0x6fe   :  { %v4324_v32 = vand.u32 4294901760, %v2929_v54 }
 0x700   :  { %v4327_v13 = vsub.f32 %v2929_v54, %v4324_v32  ;;  %2963 = vmatpush.msra.mxu2 %v4324_v32  ;;  %3198 = vmatpush.msra.mxu1 %v4324_v32 }
 0x702   :  { %v3005_v55 = vand.u32 4294901760, %v4327_v13 }
 0x704   :  { %v3006_v59 = vsub.f32 %v4327_v13, %v3005_v55  ;;  %3151 = vmatpush.msra.mxu0 %v3005_v55  ;;  %v2877_v6 = vpop.permute.xlu2 %2876 }
 0x705   :  { %v2885_v48 = vmul.f32 %v2877_v6, %v4111_v52 }
 0x706   :  { %v3007_v22 = vand.u32 4294901760, %v3006_v59 }
 0x707   :  { %v2889_v63 = vsel %vm509_vm2, %v2885_v48, 0.0 }
 0x708   :  { %3008 = vmatpush.msra.mxu3 %v3007_v22  ;;  %v4345_v18 = vand.u32 4294901760, %v2889_v63 }
 0x70a   :  { %v4349_v9 = vsub.f32 %v2889_v63, %v4345_v18 }
 0x70c   :  { %v2919_v39 = vpop.permute.xlu0 %2918  ;;  %v2873_v47 = vpop.permute.xlu2 %2872 }
 0x70d   :  { %v2928_v44 = vsel %vm509_vm2, 0.0, %v2919_v39  ;;  %v2883_v30 = vmul.f32 %v2873_v47, %v4090_v17  ;;  %v3029_v17 = vand.u32 4294901760, %v4349_v9 }
 0x70e   :  { %v4334_v16 = vand.u32 4294901760, %v2928_v44 }
 0x70f   :  { %v2887_v19 = vsel %vm509_vm2, %v2883_v30, 0.0  ;;  %v3030_v51 = vsub.f32 %v4349_v9, %v3029_v17 }
 0x710   :  { %v4337_v29 = vsub.f32 %v2928_v44, %v4334_v16  ;;  %2965 = vmatpush.msra.mxu2 %v4334_v16  ;;  %3200 = vmatpush.msra.mxu1 %v4334_v16  ;;  %v4364_v49 = vand.u32 4294901760, %v2887_v19 }
 0x711   :  { %v3031_v41 = vand.u32 4294901760, %v3030_v51 }
 0x712   :  { %v3011_v28 = vand.u32 4294901760, %v4337_v29  ;;  %v4380_v36 = vsub.f32 %v2887_v19, %v4364_v49 }
 0x714   :  { %3155 = vmatpush.msra.mxu0 %v3011_v28  ;;  %v3012_v61 = vsub.f32 %v4337_v29, %v3011_v28  ;;  %v3041_v33 = vand.u32 4294901760, %v4380_v36  ;;  %v2941_v30 = vpop.permute.xlu2 %2940 }
 0x716   :  { %v3013_v40 = vand.u32 4294901760, %v3012_v61 }
 0x718   :  { %3014 = vmatpush.msra.mxu3 %v3013_v40 }
 0x71c   :  { %v2917_v31 = vpop.permute.xlu1 %2916 }
 0x71d   :  { %v2927_v52 = vsel %vm509_vm2, 0.0, %v2917_v31  ;;  %v2915_v37 = vpop.permute.xlu0 %2914 }
 0x71e   :  { %v4352_v38 = vand.u32 4294901760, %v2927_v52  ;;  %v2926_v21 = vsel %vm509_vm2, 0.0, %v2915_v37 }
 0x71f   :  { %v4359_v14 = vand.u32 4294901760, %v2926_v21 }
 0x720   :  { %v4357_v2 = vsub.f32 %v2927_v52, %v4352_v38  ;;  %2967 = vmatpush.msra.mxu2 %v4352_v38  ;;  %3202 = vmatpush.msra.mxu1 %v4352_v38 }
 0x721   :  { %v4367_v60 = vsub.f32 %v2926_v21, %v4359_v14 }
 0x722   :  { %2969 = vmatpush.msra.mxu2 %v4359_v14  ;;  %3204 = vmatpush.msra.mxu1 %v4359_v14  ;;  %v3017_v24 = vand.u32 4294901760, %v4357_v2 }
 0x723   :  { %v3023_v35 = vand.u32 4294901760, %v4367_v60 }
 0x724   :  { %v2875_v15 = vpop.permute.xlu1 %2874  ;;  %2971 = vmatpush.msra.mxu2 %v4345_v18  ;;  %3159 = vmatpush.msra.mxu0 %v3017_v24  ;;  %v3018_v43 = vsub.f32 %v4357_v2, %v3017_v24 }
 0x725   :  { %v2884_v5 = vmul.f32 %v2875_v15, %v4100_v62  ;;  %3206 = vmatpush.msra.mxu1 %v4345_v18  ;;  %v2931_v20 = vpop.permute.xlu0 %2930  ;;  %v3024_v26 = vsub.f32 %v4367_v60, %v3023_v35  ;;  %v4427_v15 = vld [vmem:[%s4448_s7] sm:$0xff]  ;;  %s3502_s7 = smov [#allocation2]  }
 0x726   :  { %3163 = vmatpush.msra.mxu0 %v3023_v35  ;;  %v3019_v11 = vand.u32 4294901760, %v3018_v43  ;;  %v2932_v23 = vsel %vm509_vm2, %v4195_v4, %v2931_v20  ;;  %s3288_s29 = sshll.u32 %s3502_s7, 4  ;;  %s3289_s29 = int_to_ptr.vmem [resolvable:$true] %s3288_s29 }
 0x727   :  { %v2888_v25 = vsel %vm509_vm2, %v2884_v5, 0.0  ;;  %v2933_v62 = vperm.slane %v2932_v23, 0  ;;  %v3025_v0 = vand.u32 4294901760, %v3024_v26 }
 0x728   :  { %v4386_v53 = vand.u32 4294901760, %v2888_v25  ;;  %3020 = vmatpush.msra.mxu3 %v3019_v11  ;;  %3167 = vmatpush.msra.mxu0 %v3029_v17 }
 0x729   :  { %vm2934_vm4 = vcmp.eq.s32.totalorder %v705_v42, %v2933_v62  ;;  %vm2935_vm5 = vcmp.eq.s32.totalorder %v706_v7, %v2933_v62  ;;  %v3501_v62 = vmov 64.0  }
 0x72a   :  { %v3034_v8 = vsub.f32 %v2888_v25, %v4386_v53  ;;  %2973 = vmatpush.msra.mxu2 %v4386_v53  ;;  %3026 = vmatpush.msra.mxu3 %v3025_v0  ;;  %v3378_v57 = vsel %vm2934_vm4, 1.0, %v3494_v34  ;;  %v3379_v4 = vsel %vm2935_vm5, 1.0, %v3494_v34  ;;  %v3042_v34 = vsub.f32 %v4380_v36, %v3041_v33 }
 0x72b   :  { %3208 = vmatpush.msra.mxu1 %v4386_v53  ;;  %v2949_v56 = vsel %vm1080_vm6, %v3378_v57, 0  ;;  %v2952_v27 = vsel %vm1080_vm6, %v3379_v4, 0  ;;  %3456 = vrcp.f32 %v3501_v62 }
 0x72c   :  { %v2871_v10 = vpop.permute.xlu1 %2870  ;;  %2975 = vmatpush.msra.mxu2 %v4364_v49  ;;  %3032 = vmatpush.msra.mxu3 %v3031_v41  ;;  %v3035_v58 = vand.u32 4294901760, %v3034_v8  ;;  %v2979_v45 = vsub.f32 %v2949_v56, %v2949_v56  ;;  %v2987_v59 = vsub.f32 %v2952_v27, %v2952_v27  ;;  %v3043_v48 = vand.u32 4294901760, %v3042_v34 }
 0x72d   :  { %v2882_v1 = vmul.f32 %v2871_v10, %v4083_v46  ;;  %3210 = vmatpush.msra.mxu1 %v4364_v49  ;;  %v2943_v37 = vpop.permute.xlu0 %2942 }
 0x72e   :  { %3171 = vmatpush.msra.mxu0 %v3035_v58  ;;  %v3036_v50 = vsub.f32 %v3034_v8, %v3035_v58  ;;  %v2980_v54 = vand.u32 4294901760, %v2979_v45  ;;  %v2988_v28 = vand.u32 4294901760, %v2987_v59  ;;  %v2947_v17 = vsel %vm509_vm2, %v2943_v37, %v3769_v12 }
 0x72f   :  { %v2886_v55 = vsel %vm509_vm2, %v2882_v1, 0.0 }
 0x730   :  { %v2976_v22 = vand.u32 4294901760, %v2886_v55  ;;  %3175 = vmatpush.msra.mxu0 %v3041_v33  ;;  %v3037_v39 = vand.u32 4294901760, %v3036_v50  ;;  %v2981_v44 = vsub.f32 %v2979_v45, %v2980_v54  ;;  %v2989_v40 = vsub.f32 %v2987_v59, %v2988_v28 }
 0x731   :  { %v3457_v0 = vpop.eup %3456 }
 0x732   :  { %v3046_v6 = vsub.f32 %v2886_v55, %v2976_v22  ;;  %2977 = vmatpush.msra.mxu2 %v2976_v22  ;;  %3038 = vmatpush.msra.mxu3 %v3037_v39  ;;  %v2982_v46 = vand.u32 4294901760, %v2981_v44  ;;  %v3232_v41 = vmul.f32 64.0, %v3457_v0 }
 0x733   :  { %3212 = vmatpush.msra.mxu1 %v2976_v22 }
 0x734   :  { %3070 = vmatpush.msrb.mxu2 %v4327_v13  ;;  %3044 = vmatpush.msra.mxu3 %v3043_v48  ;;  %v3047_v61 = vand.u32 4294901760, %v3046_v6  ;;  %v2990_v13 = vand.u32 4294901760, %v2989_v40 }
 0x735   :  { %3384 = vmatmul.msk.f32.vlgmr.msra.gmra.mxu1 %vm1080_vm6, %v3378_v57  ;;  %2983 = vmatmul.f32.vlgmr.msra.gmra.mxu2 %v2982_v46 }
 0x736   :  { %3073 = vmatpush.msrb.mxu2 %v4337_v29  ;;  %3179 = vmatpush.msra.mxu0 %v3047_v61  ;;  %v3048_v63 = vsub.f32 %v3046_v6, %v3047_v61 }
 0x737   :  { %3382 = vmatmul.msk.f32.vlgmr.msra.gmra.mxu0 %vm1080_vm6, %v3378_v57 }
 0x738   :  { %3076 = vmatpush.msrb.mxu2 %v4357_v2  ;;  %v3049_v47 = vand.u32 4294901760, %v3048_v63 }
 0x73a   :  { %3079 = vmatpush.msrb.mxu2 %v4367_v60  ;;  %3050 = vmatpush.msra.mxu3 %v3049_v47 }
 0x73b   :  { %3380 = vmatmul.msk.f32.vlgmr.msra.gmra.mxu3 %vm1080_vm6, %v3378_v57 }
 0x73c   :  { %3082 = vmatpush.msrb.mxu2 %v4349_v9  ;;  %3112 = vmatpush.msrb.mxu3 %v4324_v32  ;;  %v2946_v9 = vsel %vm509_vm2, %v2941_v30, %v3754_v3  ;;  %v3222_v3 = vperm.slane %v4427_v15, 2  ;;  %vm3236_vm2 = vweird.f32 %v3457_v0 }
 0x73d   :  { %2991 = vmatmul.f32.gmra.mxu2 %v2990_v13  ;;  %3385 = vmatmul.msk.f32.gmra.mxu1 %vm1080_vm6, %v3379_v4 }
 0x73e   :  { %3085 = vmatpush.msrb.mxu2 %v3034_v8  ;;  %3114 = vmatpush.msrb.mxu3 %v4334_v16  ;;  %v3233_v8 = vsub.f32 1.0, %v3232_v41 }
 0x73f   :  { %3383 = vmatmul.msk.f32.gmra.mxu0 %vm1080_vm6, %v3379_v4 }
 0x740   :  { %3088 = vmatpush.msrb.mxu2 %v4380_v36  ;;  %3116 = vmatpush.msrb.mxu3 %v4352_v38  ;;  %v3234_v33 = vmul.f32 %v3457_v0, %v3233_v8 }
 0x742   :  { %3091 = vmatpush.msrb.mxu2 %v3046_v6  ;;  %3118 = vmatpush.msrb.mxu3 %v4359_v14  ;;  %v3235_v57 = vadd.f32 %v3457_v0, %v3234_v33 }
 0x743   :  { %3381 = vmatmul.msk.f32.gmra.mxu3 %vm1080_vm6, %v3379_v4 }
 0x744   :  { %3120 = vmatpush.msrb.mxu3 %v4345_v18  ;;  %v3237_v4 = vsel %vm3236_vm2, %v3457_v0, %v3235_v57 }
 0x745   :  { %3094 = vmatmul.f32.vlgmr.msrb.gmra.mxu2 %v2979_v45 }
 0x746   :  { %3122 = vmatpush.msrb.mxu3 %v4386_v53 }
 0x748   :  { %3124 = vmatpush.msrb.mxu3 %v4364_v49 }
 0x74a   :  { %3126 = vmatpush.msrb.mxu3 %v2976_v22 }
 0x74b   :  { %3130 = vmatmul.f32.vlgmr.msrb.gmra.mxu3 %v2980_v54 }
 0x74d   :  { %3099 = vmatmul.f32.gmra.mxu2 %v2987_v59 }
 0x753   :  { %3136 = vmatmul.f32.gmra.mxu3 %v2988_v28 }
 0x7b2   :  { %v3215_v49 = vpop.f32.mrf.mxu1 }
 0x7b4   :  { %v3182_v2 = vpop.f32.mrf.mxu0 }
 0x7b8   :  { %v2984_v32 = vpop.f32.mrf.mxu2 }
 0x7b9   :  { %v2985_v38 = vadd.f32 %v2984_v32, %v2946_v9  ;;  %v3279_v9 = vperm.slane %v4427_v15, 4 }
 0x7ba   :  { %v3219_v26 = vpop.f32.mrf.mxu1 }
 0x7bc   :  { %v3186_v12 = vpop.f32.mrf.mxu0 }
 0x7be   :  { %v3053_v16 = vpop.f32.mrf.mxu3 }
 0x7bf   :  { %v3054_v18 = vadd.f32 %v3053_v16, %v2985_v38  ;;  %v3276_v16 = vperm.slane %v4427_v15, 3 }
 0x7c0   :  { %v2992_v29 = vpop.f32.mrf.mxu2 }
 0x7c1   :  { %v2993_v60 = vadd.f32 %v2992_v29, %v2947_v17 }
 0x7c6   :  { %v3057_v31 = vpop.f32.mrf.mxu3 }
 0x7c7   :  { %v3058_v35 = vadd.f32 %v3057_v31, %v2993_v60 }
 0x7c8   :  { %v3095_v52 = vpop.f32.mrf.mxu2 }
 0x7c9   :  { %v3096_v19 = vadd.f32 %v3095_v52, %v3054_v18 }
 0x7ce   :  { %v3131_v21 = vpop.f32.mrf.mxu3 }
 0x7cf   :  { %v3132_v14 = vadd.f32 %v3131_v21, %v3096_v19 }
 0x7d0   :  { %v3100_v42 = vpop.f32.mrf.mxu2 }
 0x7d1   :  { %v3183_v24 = vadd.f32 %v3182_v2, %v3132_v14  ;;  %v3101_v5 = vadd.f32 %v3100_v42, %v3058_v35 }
 0x7d3   :  { %v3216_v43 = vadd.f32 %v3215_v49, %v3183_v24 }
 0x7d5   :  { %v3223_v51 = vadd.f32 %v3222_v3, %v3216_v43 }
 0x7d6   :  { %v3137_v36 = vpop.f32.mrf.mxu3 }
 0x7d7   :  { %v3138_v7 = vadd.f32 %v3137_v36, %v3101_v5  ;;  %v3225_v20 = vsel %vm1080_vm6, %v3223_v51, 0.0 }
 0x7d8   :  { %3226 = vadd.xlane.f32.xlu1 %v3225_v20 }
 0x7d9   :  { %v3187_v11 = vadd.f32 %v3186_v12, %v3138_v7 }
 0x7db   :  { %v3220_v25 = vadd.f32 %v3219_v26, %v3187_v11 }
 0x7dd   :  { %v3224_v23 = vadd.f32 %v3222_v3, %v3220_v25 }
 0x7df   :  { %v3228_v53 = vsel %vm1080_vm6, %v3224_v23, 0.0 }
 0x7e0   :  { %3229 = vadd.xlane.f32.xlu2 %v3228_v53 }
 0x84b   :  { %v3227_v56 = vpop.xlane.xlu1 %3226 }
 0x84c   :  { %v3238_v27 = vmul.f32 %v3237_v4, %v3227_v56 }
 0x84e   :  { %v3240_v10 = vsub.f32 %v3223_v51, %v3238_v27 }
 0x850   :  { %v3242_v58 = vmul.f32 %v3240_v10, %v3240_v10 }
 0x852   :  { %v3244_v45 = vsel %vm1080_vm6, %v3242_v58, 0.0 }
 0x853   :  { %3245 = vadd.xlane.f32.xlu0 %v3244_v45  ;;  %v3230_v1 = vpop.xlane.xlu2 %3229 }
 0x854   :  { %v3239_v50 = vmul.f32 %v3237_v4, %v3230_v1 }
 0x856   :  { %v3241_v34 = vsub.f32 %v3224_v23, %v3239_v50 }
 0x858   :  { %v3243_v54 = vmul.f32 %v3241_v34, %v3241_v34 }
 0x85a   :  { %v3247_v55 = vsel %vm1080_vm6, %v3243_v54, 0.0 }
 0x85b   :  { %3248 = vadd.xlane.f32.xlu1 %v3247_v55 }
 0x8c6   :  { %v3246_v59 = vpop.xlane.xlu0 %3245 }
 0x8c7   :  { %v3250_v22 = vmul.f32 %v3246_v59, %v3237_v4 }
 0x8c9   :  { %v3252_v39 = vadd.f32 1e-05, %v3250_v22 }
 0x8cb   :  { %3458 = vrsqrt.f32 %v3252_v39  ;;  %vm3260_vm8 = vweird.f32 %v3252_v39 }
 0x8ce   :  { %v3249_v44 = vpop.xlane.xlu1 %3248 }
 0x8cf   :  { %v3251_v6 = vmul.f32 %v3249_v44, %v3237_v4 }
 0x8d1   :  { %v3459_v48 = vpop.eup %3458  ;;  %v3253_v46 = vadd.f32 1e-05, %v3251_v6 }
 0x8d2   :  { %v3255_v28 = vmul.f32 %v3459_v48, %v3252_v39  ;;  %vm3261_vm7 = vweird.f32 %v3459_v48 }
 0x8d3   :  { %3460 = vrsqrt.f32 %v3253_v46  ;;  %vm3262_vm9 = vmor %vm3260_vm8, %vm3261_vm7  ;;  %vm3270_vm11 = vweird.f32 %v3253_v46 }
 0x8d4   :  { %v3256_v61 = vmul.f32 %v3459_v48, %v3255_v28 }
 0x8d6   :  { %v3257_v63 = vmul.f32 0.5, %v3256_v61 }
 0x8d8   :  { %v3258_v40 = vsub.f32 1.5, %v3257_v63 }
 0x8d9   :  { %v3461_v47 = vpop.eup %3460 }
 0x8da   :  { %v3259_v13 = vmul.f32 %v3459_v48, %v3258_v40  ;;  %v3265_v32 = vmul.f32 %v3461_v47, %v3253_v46  ;;  %vm3271_vm10 = vweird.f32 %v3461_v47 }
 0x8db   :  { %vm3272_vm12 = vmor %vm3270_vm11, %vm3271_vm10 }
 0x8dc   :  { %v3263_v29 = vsel %vm3262_vm9, %v3459_v48, %v3259_v13  ;;  %v3266_v30 = vmul.f32 %v3461_v47, %v3265_v32 }
 0x8dd   :  { %v3274_v31 = vmul.f32 %v3263_v29, %v3240_v10 }
 0x8de   :  { %v3267_v52 = vmul.f32 0.5, %v3266_v30 }
 0x8df   :  { %v3277_v38 = vmul.f32 %v3276_v16, %v3274_v31 }
 0x8e0   :  { %v3268_v18 = vsub.f32 1.5, %v3267_v52 }
 0x8e1   :  { %v3280_v37 = vadd.f32 %v3279_v9, %v3277_v38 }
 0x8e2   :  { %v3269_v19 = vmul.f32 %v3461_v47, %v3268_v18 }
 0x8e3   :  { %3282 = vst.msk [vmem:[#allocation2] sm:$0xff] %vm1080_vm6, %v3280_v37 }
 0x8e4   :  { %v3273_v21 = vsel %vm3272_vm12, %v3461_v47, %v3269_v19 }
 0x8e5   :  { %v3275_v2 = vmul.f32 %v3273_v21, %v3241_v34 }
 0x8e7   :  { %v3278_v14 = vmul.f32 %v3276_v16, %v3275_v2 }
 0x8e9   :  { %v3281_v17 = vadd.f32 %v3279_v9, %v3278_v14 }
 0x8eb   :  { %3283 = vst.msk [vmem:[#allocation2 + $0x8] sm:$0xff] %vm1080_vm6, %v3281_v17 }
 0x8ec   :  { %3296 = dma.vmem_to_hbm [thread:$0]  %s3289_s29, 256, %s3291_s9, [#allocation3], %s3503_s10, %s3503_s10, %s3504_s11  }
 0x8ed   :  { %3491 = dma.done.wait [#allocation3], 256  }
 0x8ee   :  { %3492 = vsyncadd [#allocation3], 4294967040 }
 0x8ef   :  { %3301 = vsyncpa [#allocation3], 1 }

</bundles_post_ra>
